<compile_context>
chip_gen: v5e
topology: v5e:2x2
jax: 0.10.0
libtpu: 0.0.40
codegen_flags: <defaults>
</compile_context>

<pallas_src>
import functools

import jax
import jax.numpy as jnp
from jax.experimental import pallas as pl
from jax.experimental.pallas import tpu as pltpu

EMBED_DIM = 256
NUM_HEADS = 2
FF_DIM = 256
SEQ_LEN = 8
BATCH = 2
LN_EPS = 1e-6      # Python float -> jaxpr literal, not a captured constant
NEG_BIAS = -1e30   # Python float, used only on the host to build the bias


def _layer_norm(h, gamma, beta):
    mu = jnp.mean(h, axis=-1, keepdims=True)
    xc = h - mu
    var = jnp.mean(xc * xc, axis=-1, keepdims=True)
    return xc * jax.lax.rsqrt(var + LN_EPS) * gamma + beta


def transformer_block_kernel(
    x_ref,        # (R, D)   f32   R = seqs_per_block * S rows for this step
    bias_ref,     # (R, R)   f32   additive block-diagonal causal bias {0,-1e30}
    wqkv_ref,     # (D, 3D)  bf16  fused + pre-transposed [q|k|v]
    bqkv_ref,     # (1, 3D)  f32
    wo_ref,       # (D, D)   bf16  pre-transposed out-proj
    bo_ref,       # (1, D)   f32
    w1_ref,       # (D, F)   bf16  pre-transposed
    b1_ref,       # (1, F)   f32
    w2_ref,       # (F, D)   bf16  pre-transposed
    b2_ref,       # (1, D)   f32
    g1_ref, be1_ref, g2_ref, be2_ref,   # (1, D) f32
    o_ref,        # (R, D)
    *,
    num_heads: int,
):
    x = x_ref[...]                                   # f32, (R, D)
    R, D = x.shape
    hd = D // num_heads
    scale = 1.0 / float(hd) ** 0.5                   # Python float (literal)

    # ---- fused QKV projection: one wide MXU op, bf16 operands / f32 acc ----
    qkv = jnp.dot(x.astype(jnp.bfloat16), wqkv_ref[...],
                  preferred_element_type=jnp.float32) + bqkv_ref[0]
    q = qkv[:, 0 * D:1 * D]
    k = qkv[:, 1 * D:2 * D]
    v = qkv[:, 2 * D:3 * D]

    bias = bias_ref[...]                             # (R, R) additive mask

    # ---- per-head attention (static head loop, head_dim = 128 = lane width).
    #      Head contexts land in lane-aligned slots of one bf16 buffer so the
    #      out-projection is a single (R,D)@(D,D) matmul.
    head_ctx = []
    for h in range(num_heads):
        qh = q[:, h * hd:(h + 1) * hd].astype(jnp.bfloat16)
        kh = k[:, h * hd:(h + 1) * hd].astype(jnp.bfloat16)
        vh = v[:, h * hd:(h + 1) * hd].astype(jnp.bfloat16)
        s = jax.lax.dot_general(qh, kh, (((1,), (1,)), ((), ())),
                                preferred_element_type=jnp.float32)
        s = s * scale + bias
        m = jnp.max(s, axis=-1, keepdims=True)
        p = jnp.exp(s - m)
        inv_l = pl.reciprocal(jnp.sum(p, axis=-1, keepdims=True), approx=True)
        p = (p * inv_l).astype(jnp.bfloat16)
        head_ctx.append(jnp.dot(p, vh, preferred_element_type=jnp.float32))
    ctx = jnp.concatenate(head_ctx, axis=-1).astype(jnp.bfloat16)      # (R, D)
    attn_out = jnp.dot(ctx, wo_ref[...],
                       preferred_element_type=jnp.float32) + bo_ref[0]
    # dropout1: identity (inference / eval mode)

    # ---- residual + LayerNorm1 (f32) ----
    out1 = _layer_norm(x + attn_out, g1_ref[0], be1_ref[0])

    # ---- FFN: Linear -> ReLU -> Linear (bf16 MXU operands, f32 acc) ----
    f1 = jnp.dot(out1.astype(jnp.bfloat16), w1_ref[...],
                 preferred_element_type=jnp.float32) + b1_ref[0]
    f1 = jnp.maximum(f1, 0.0)
    f2 = jnp.dot(f1.astype(jnp.bfloat16), w2_ref[...],
                 preferred_element_type=jnp.float32) + b2_ref[0]
    # dropout2: identity (inference / eval mode)

    # ---- residual + LayerNorm2 ----
    o_ref[...] = _layer_norm(out1 + f2, g2_ref[0], be2_ref[0]).astype(o_ref.dtype)


def transformer_block(x, params, *, seqs_per_block=None):
    B, S, D = x.shape
    F = params["w1"].shape[0]
    H = NUM_HEADS
    hd = D // H

    if seqs_per_block is None:
        # Target up to ~256 rows per step (MXU M fill) while keeping >=2 grid
        # steps when the batch allows it, so weights stay VMEM-resident across
        # steps, activation DMA overlaps compute, and v7x's two TensorCores
        # split the row blocks ("parallel" axis).
        target = max(1, min(max(B // 2, 1), max(1, 256 // S)))
        seqs_per_block = max(d for d in range(1, target + 1) if B % d == 0)
    assert B % seqs_per_block == 0
    rows = seqs_per_block * S
    n_steps = B // seqs_per_block
    BS = B * S

    x2 = x.reshape(BS, D)

    # Host-side prep: fuse QKV, pre-transpose all weights, cast MXU weights to
    # bf16, and build the additive block-diagonal causal bias for one row tile.
    wqkv_t = jnp.concatenate(
        [params["wq"], params["wk"], params["wv"]], axis=0).T.astype(jnp.bfloat16)
    bqkv = jnp.concatenate([params["bq"], params["bk"], params["bv"]], axis=1)
    wo_t = params["wo"].T.astype(jnp.bfloat16)
    w1_t = params["w1"].T.astype(jnp.bfloat16)
    w2_t = params["w2"].T.astype(jnp.bfloat16)

    r = jnp.arange(rows)
    same_seq = (r[:, None] // S) == (r[None, :] // S)
    causal = (r[:, None] % S) >= (r[None, :] % S)
    bias = jnp.where(same_seq & causal, 0.0, NEG_BIAS).astype(jnp.float32)

    resident = [
        bias, wqkv_t, bqkv, wo_t, params["bo"],
        w1_t, params["b1"], w2_t, params["b2"],
        params["g1"], params["be1"], params["g2"], params["be2"],
    ]

    def resident_spec(a):
        nd = a.ndim
        # Constant block index -> DMA'd once, stays VMEM-resident across steps.
        return pl.BlockSpec(a.shape, lambda i, _nd=nd: (0,) * _nd)

    kernel = functools.partial(transformer_block_kernel, num_heads=H)

    flops = int(2 * BS * D * 3 * D                       # fused QKV
                + 4 * H * n_steps * rows * rows * hd     # q@k^T + p@v
                + 2 * BS * D * D                         # out-proj
                + 2 * BS * D * F + 2 * BS * F * D)       # FFN
    transcendentals = int(H * n_steps * rows * rows + 4 * BS)   # exp + rsqrt/recip
    bytes_accessed = int(x2.size * 4 * 2
                         + sum(int(a.size) * a.dtype.itemsize for a in resident))
    cost = pl.CostEstimate(flops=flops, transcendentals=transcendentals,
                           bytes_accessed=bytes_accessed)

    out2d = pl.pallas_call(
        kernel,
        out_shape=jax.ShapeDtypeStruct((BS, D), x.dtype),
        grid_spec=pltpu.PrefetchScalarGridSpec(
            num_scalar_prefetch=0,
            grid=(n_steps,),                              # blocks of whole sequences
            in_specs=[pl.BlockSpec((rows, D), lambda i: (i, 0))]
                     + [resident_spec(a) for a in resident],
            out_specs=pl.BlockSpec((rows, D), lambda i: (i, 0)),
        ),
        compiler_params=pltpu.CompilerParams(
            dimension_semantics=("parallel",)),            # megacore on v7x
        cost_estimate=cost,
    )(x2, *resident)
    return out2d.reshape(B, S, D)


def reference_block(x, p):
    # Pure-JAX reference using the same bf16-operand / f32-accumulation matmul
    # convention as the kernel, so the comparison tolerance can stay tight.
    B, S, D = x.shape
    H, hd = NUM_HEADS, D // NUM_HEADS
    bf16 = jnp.bfloat16
    scale = 1.0 / float(hd) ** 0.5

    def mm(a, w):  # PyTorch Linear: a @ w.T
        return jnp.dot(a.astype(bf16), w.T.astype(bf16),
                       preferred_element_type=jnp.float32)

    q = mm(x, p["wq"]) + p["bq"][0]
    k = mm(x, p["wk"]) + p["bk"][0]
    v = mm(x, p["wv"]) + p["bv"][0]

    def heads(t):
        return t.reshape(B, S, H, hd).transpose(0, 2, 1, 3)   # (B,H,S,hd)

    qh, kh, vh = heads(q), heads(k), heads(v)
    s = jnp.einsum("bhqd,bhkd->bhqk", qh.astype(bf16), kh.astype(bf16),
                   preferred_element_type=jnp.float32) * scale
    mask = jnp.tril(jnp.ones((S, S), dtype=bool))
    s = jnp.where(mask[None, None], s, -1e30)
    m = jnp.max(s, -1, keepdims=True)
    pexp = jnp.exp(s - m)
    w = pexp / jnp.sum(pexp, -1, keepdims=True)
    a = jnp.einsum("bhqk,bhkd->bhqd", w.astype(bf16), vh.astype(bf16),
                   preferred_element_type=jnp.float32)
    a = a.transpose(0, 2, 1, 3).reshape(B, S, D)
    attn_out = mm(a, p["wo"]) + p["bo"][0]

    def ln(h, g, b):
        mu = jnp.mean(h, -1, keepdims=True)
        var = jnp.mean((h - mu) ** 2, -1, keepdims=True)
        return (h - mu) * jax.lax.rsqrt(var + LN_EPS) * g[0] + b[0]

    out1 = ln(x + attn_out, p["g1"], p["be1"])
    f = mm(jnp.maximum(mm(out1, p["w1"]) + p["b1"][0], 0.0), p["w2"]) + p["b2"][0]
    return ln(out1 + f, p["g2"], p["be2"])


def init_params(key, embed_dim, num_heads, ff_dim):
    ks = jax.random.split(key, 8)
    scale = 0.02

    def rnd(k, shape):
        return (scale * jax.random.normal(k, shape)).astype(jnp.float32)

    return {
        # MultiheadAttention in_proj split into q/k/v (each (D,D)), out_proj (D,D)
        "wq": rnd(ks[0], (embed_dim, embed_dim)),
        "wk": rnd(ks[1], (embed_dim, embed_dim)),
        "wv": rnd(ks[2], (embed_dim, embed_dim)),
        "bq": rnd(ks[3], (1, embed_dim)),
        "bk": rnd(ks[4], (1, embed_dim)),
        "bv": rnd(ks[5], (1, embed_dim)),
        "wo": rnd(ks[6], (embed_dim, embed_dim)),
        "bo": jnp.zeros((1, embed_dim), jnp.float32),
        # FFN
        "w1": rnd(ks[7], (ff_dim, embed_dim)),
        "b1": jnp.zeros((1, ff_dim), jnp.float32),
        "w2": rnd(jax.random.fold_in(key, 99), (embed_dim, ff_dim)),
        "b2": jnp.zeros((1, embed_dim), jnp.float32),
        # LayerNorms
        "g1": jnp.ones((1, embed_dim), jnp.float32),
        "be1": jnp.zeros((1, embed_dim), jnp.float32),
        "g2": jnp.ones((1, embed_dim), jnp.float32),
        "be2": jnp.zeros((1, embed_dim), jnp.float32),
    }


if __name__ == "__main__":
    key = jax.random.PRNGKey(0)
    kx, kp = jax.random.split(key)
    x = jax.random.normal(kx, (BATCH, SEQ_LEN, EMBED_DIM), dtype=jnp.float32)
    params = init_params(kp, EMBED_DIM, NUM_HEADS, FF_DIM)

    out = transformer_block(x, params)
    out = jax.block_until_ready(out)

    ref = reference_block(x, params)
    assert out.shape == (BATCH, SEQ_LEN, EMBED_DIM)
    # Tolerance covers the approximate softmax reciprocal (EUP) and
    # bf16-operand accumulation-order differences vs. the XLA reference.
    assert jnp.allclose(out, ref, rtol=1e-2, atol=1e-2), "mismatch vs reference"

    print("KERNEL_OK")
</pallas_src>

<mosaic_0001>
module attributes {stable_mosaic.version = 11 : i64} {
  func.func @transformer_block_kernel(%arg0: i32, %arg1: memref<8x256xf32, #tpu.memory_space<vmem>>, %arg2: memref<8x8xf32, #tpu.memory_space<vmem>>, %arg3: memref<256x768xbf16, #tpu.memory_space<vmem>>, %arg4: memref<1x768xf32, #tpu.memory_space<vmem>>, %arg5: memref<256x256xbf16, #tpu.memory_space<vmem>>, %arg6: memref<1x256xf32, #tpu.memory_space<vmem>>, %arg7: memref<256x256xbf16, #tpu.memory_space<vmem>>, %arg8: memref<1x256xf32, #tpu.memory_space<vmem>>, %arg9: memref<256x256xbf16, #tpu.memory_space<vmem>>, %arg10: memref<1x256xf32, #tpu.memory_space<vmem>>, %arg11: memref<1x256xf32, #tpu.memory_space<vmem>>, %arg12: memref<1x256xf32, #tpu.memory_space<vmem>>, %arg13: memref<1x256xf32, #tpu.memory_space<vmem>>, %arg14: memref<1x256xf32, #tpu.memory_space<vmem>>, %arg15: memref<8x256xf32, #tpu.memory_space<vmem>>) attributes {dimension_semantics = [#tpu.dimension_semantics<parallel>], iteration_bounds = array<i64: 2>, scalar_prefetch = 0 : i64, scratch_operands = 0 : i64, tpu.core_type = #tpu.core_type<tc>, window_params = [{transform_indices = @transform_0, window_bounds = array<i64: 8, 256>}, {pipeline_mode = #tpu.pipeline_mode<synchronous>, transform_indices = @transform_1, window_bounds = array<i64: 8, 8>}, {pipeline_mode = #tpu.pipeline_mode<synchronous>, transform_indices = @transform_2, window_bounds = array<i64: 256, 768>}, {pipeline_mode = #tpu.pipeline_mode<synchronous>, transform_indices = @transform_3, window_bounds = array<i64: 1, 768>}, {pipeline_mode = #tpu.pipeline_mode<synchronous>, transform_indices = @transform_4, window_bounds = array<i64: 256, 256>}, {pipeline_mode = #tpu.pipeline_mode<synchronous>, transform_indices = @transform_5, window_bounds = array<i64: 1, 256>}, {pipeline_mode = #tpu.pipeline_mode<synchronous>, transform_indices = @transform_6, window_bounds = array<i64: 256, 256>}, {pipeline_mode = #tpu.pipeline_mode<synchronous>, transform_indices = @transform_7, window_bounds = array<i64: 1, 256>}, {pipeline_mode = #tpu.pipeline_mode<synchronous>, transform_indices = @transform_8, window_bounds = array<i64: 256, 256>}, {pipeline_mode = #tpu.pipeline_mode<synchronous>, transform_indices = @transform_9, window_bounds = array<i64: 1, 256>}, {pipeline_mode = #tpu.pipeline_mode<synchronous>, transform_indices = @transform_10, window_bounds = array<i64: 1, 256>}, {pipeline_mode = #tpu.pipeline_mode<synchronous>, transform_indices = @transform_11, window_bounds = array<i64: 1, 256>}, {pipeline_mode = #tpu.pipeline_mode<synchronous>, transform_indices = @transform_12, window_bounds = array<i64: 1, 256>}, {pipeline_mode = #tpu.pipeline_mode<synchronous>, transform_indices = @transform_13, window_bounds = array<i64: 1, 256>}, {transform_indices = @transform_14, window_bounds = array<i64: 8, 256>}]} {
    %c0 = arith.constant 0 : index
    %c0_0 = arith.constant 0 : index
    %0 = vector.load %arg1[%c0, %c0_0] : memref<8x256xf32, #tpu.memory_space<vmem>>, vector<8x256xf32>
    %1 = arith.truncf %0 : vector<8x256xf32> to vector<8x256xbf16>
    %c0_1 = arith.constant 0 : index
    %c0_2 = arith.constant 0 : index
    %2 = vector.load %arg3[%c0_1, %c0_2] : memref<256x768xbf16, #tpu.memory_space<vmem>>, vector<256x768xbf16>
    %cst = arith.constant dense<0.000000e+00> : vector<8x768xf32>
    %3 = tpu.matmul %1, %2, %cst {dimension_numbers = #tpu.dot_dimension_numbers<[1], [0], [0], [1], [0, 0, 1, 1], [], []>} : vector<8x256xbf16>, vector<256x768xbf16>, vector<8x768xf32> -> vector<8x768xf32>
    %c0_3 = arith.constant 0 : index
    %c0_4 = arith.constant 0 : index
    %4 = vector.load %arg4[%c0_3, %c0_4] : memref<1x768xf32, #tpu.memory_space<vmem>>, vector<1x768xf32>
    %5 = vector.shape_cast %4 : vector<1x768xf32> to vector<768xf32>
    %6 = vector.shape_cast %5 : vector<768xf32> to vector<1x768xf32>
    %7 = vector.broadcast %6 : vector<1x768xf32> to vector<8x768xf32>
    %8 = arith.addf %3, %7 : vector<8x768xf32>
    %9 = vector.extract_strided_slice %8 {offsets = [0, 0], sizes = [8, 256], strides = [1, 1]} : vector<8x768xf32> to vector<8x256xf32>
    %10 = vector.extract_strided_slice %8 {offsets = [0, 256], sizes = [8, 256], strides = [1, 1]} : vector<8x768xf32> to vector<8x256xf32>
    %11 = vector.extract_strided_slice %8 {offsets = [0, 512], sizes = [8, 256], strides = [1, 1]} : vector<8x768xf32> to vector<8x256xf32>
    %c0_5 = arith.constant 0 : index
    %c0_6 = arith.constant 0 : index
    %12 = vector.load %arg2[%c0_5, %c0_6] : memref<8x8xf32, #tpu.memory_space<vmem>>, vector<8x8xf32>
    %13 = vector.extract_strided_slice %9 {offsets = [0, 0], sizes = [8, 128], strides = [1, 1]} : vector<8x256xf32> to vector<8x128xf32>
    %14 = arith.truncf %13 : vector<8x128xf32> to vector<8x128xbf16>
    %15 = vector.extract_strided_slice %10 {offsets = [0, 0], sizes = [8, 128], strides = [1, 1]} : vector<8x256xf32> to vector<8x128xf32>
    %16 = arith.truncf %15 : vector<8x128xf32> to vector<8x128xbf16>
    %17 = vector.extract_strided_slice %11 {offsets = [0, 0], sizes = [8, 128], strides = [1, 1]} : vector<8x256xf32> to vector<8x128xf32>
    %18 = arith.truncf %17 : vector<8x128xf32> to vector<8x128xbf16>
    %cst_7 = arith.constant dense<0.000000e+00> : vector<8x8xf32>
    %19 = tpu.matmul %14, %16, %cst_7 {dimension_numbers = #tpu.dot_dimension_numbers<[1], [1], [0], [0], [0, 0, 1, 0], [], []>} : vector<8x128xbf16>, vector<8x128xbf16>, vector<8x8xf32> -> vector<8x8xf32>
    %cst_8 = arith.constant 0.0883883461 : f32
    %20 = vector.broadcast %cst_8 : f32 to vector<8x8xf32>
    %21 = arith.mulf %19, %20 : vector<8x8xf32>
    %22 = arith.addf %21, %12 : vector<8x8xf32>
    %cst_9 = arith.constant dense<0xFF800000> : vector<8xf32>
    %23 = vector.multi_reduction <maximumf>, %22, %cst_9 [1] : vector<8x8xf32> to vector<8xf32>
    %24 = vector.shape_cast %23 : vector<8xf32> to vector<8x1xf32>
    %25 = vector.broadcast %24 : vector<8x1xf32> to vector<8x8xf32>
    %26 = arith.subf %22, %25 : vector<8x8xf32>
    %27 = math.exp %26 : vector<8x8xf32>
    %cst_10 = arith.constant dense<0.000000e+00> : vector<8xf32>
    %28 = vector.multi_reduction <add>, %27, %cst_10 [1] : vector<8x8xf32> to vector<8xf32>
    %29 = vector.shape_cast %28 : vector<8xf32> to vector<8x1xf32>
    %30 = tpu.reciprocal %29 {approx = true} : vector<8x1xf32> -> vector<8x1xf32>
    %31 = vector.broadcast %30 : vector<8x1xf32> to vector<8x8xf32>
    %32 = arith.mulf %27, %31 : vector<8x8xf32>
    %33 = arith.truncf %32 : vector<8x8xf32> to vector<8x8xbf16>
    %cst_11 = arith.constant dense<0.000000e+00> : vector<8x128xf32>
    %34 = tpu.matmul %33, %18, %cst_11 {dimension_numbers = #tpu.dot_dimension_numbers<[1], [0], [0], [1], [0, 0, 1, 1], [], []>} : vector<8x8xbf16>, vector<8x128xbf16>, vector<8x128xf32> -> vector<8x128xf32>
    %35 = vector.extract_strided_slice %9 {offsets = [0, 128], sizes = [8, 128], strides = [1, 1]} : vector<8x256xf32> to vector<8x128xf32>
    %36 = arith.truncf %35 : vector<8x128xf32> to vector<8x128xbf16>
    %37 = vector.extract_strided_slice %10 {offsets = [0, 128], sizes = [8, 128], strides = [1, 1]} : vector<8x256xf32> to vector<8x128xf32>
    %38 = arith.truncf %37 : vector<8x128xf32> to vector<8x128xbf16>
    %39 = vector.extract_strided_slice %11 {offsets = [0, 128], sizes = [8, 128], strides = [1, 1]} : vector<8x256xf32> to vector<8x128xf32>
    %40 = arith.truncf %39 : vector<8x128xf32> to vector<8x128xbf16>
    %cst_12 = arith.constant dense<0.000000e+00> : vector<8x8xf32>
    %41 = tpu.matmul %36, %38, %cst_12 {dimension_numbers = #tpu.dot_dimension_numbers<[1], [1], [0], [0], [0, 0, 1, 0], [], []>} : vector<8x128xbf16>, vector<8x128xbf16>, vector<8x8xf32> -> vector<8x8xf32>
    %cst_13 = arith.constant 0.0883883461 : f32
    %42 = vector.broadcast %cst_13 : f32 to vector<8x8xf32>
    %43 = arith.mulf %41, %42 : vector<8x8xf32>
    %44 = arith.addf %43, %12 : vector<8x8xf32>
    %cst_14 = arith.constant dense<0xFF800000> : vector<8xf32>
    %45 = vector.multi_reduction <maximumf>, %44, %cst_14 [1] : vector<8x8xf32> to vector<8xf32>
    %46 = vector.shape_cast %45 : vector<8xf32> to vector<8x1xf32>
    %47 = vector.broadcast %46 : vector<8x1xf32> to vector<8x8xf32>
    %48 = arith.subf %44, %47 : vector<8x8xf32>
    %49 = math.exp %48 : vector<8x8xf32>
    %cst_15 = arith.constant dense<0.000000e+00> : vector<8xf32>
    %50 = vector.multi_reduction <add>, %49, %cst_15 [1] : vector<8x8xf32> to vector<8xf32>
    %51 = vector.shape_cast %50 : vector<8xf32> to vector<8x1xf32>
    %52 = tpu.reciprocal %51 {approx = true} : vector<8x1xf32> -> vector<8x1xf32>
    %53 = vector.broadcast %52 : vector<8x1xf32> to vector<8x8xf32>
    %54 = arith.mulf %49, %53 : vector<8x8xf32>
    %55 = arith.truncf %54 : vector<8x8xf32> to vector<8x8xbf16>
    %cst_16 = arith.constant dense<0.000000e+00> : vector<8x128xf32>
    %56 = tpu.matmul %55, %40, %cst_16 {dimension_numbers = #tpu.dot_dimension_numbers<[1], [0], [0], [1], [0, 0, 1, 1], [], []>} : vector<8x8xbf16>, vector<8x128xbf16>, vector<8x128xf32> -> vector<8x128xf32>
    %57 = tpu.concatenate %34, %56 in 1 : vector<8x128xf32>, vector<8x128xf32> -> vector<8x256xf32>
    %58 = arith.truncf %57 : vector<8x256xf32> to vector<8x256xbf16>
    %c0_17 = arith.constant 0 : index
    %c0_18 = arith.constant 0 : index
    %59 = vector.load %arg5[%c0_17, %c0_18] : memref<256x256xbf16, #tpu.memory_space<vmem>>, vector<256x256xbf16>
    %cst_19 = arith.constant dense<0.000000e+00> : vector<8x256xf32>
    %60 = tpu.matmul %58, %59, %cst_19 {dimension_numbers = #tpu.dot_dimension_numbers<[1], [0], [0], [1], [0, 0, 1, 1], [], []>} : vector<8x256xbf16>, vector<256x256xbf16>, vector<8x256xf32> -> vector<8x256xf32>
    %c0_20 = arith.constant 0 : index
    %c0_21 = arith.constant 0 : index
    %61 = vector.load %arg6[%c0_20, %c0_21] : memref<1x256xf32, #tpu.memory_space<vmem>>, vector<1x256xf32>
    %62 = vector.shape_cast %61 : vector<1x256xf32> to vector<256xf32>
    %63 = vector.shape_cast %62 : vector<256xf32> to vector<1x256xf32>
    %64 = vector.broadcast %63 : vector<1x256xf32> to vector<8x256xf32>
    %65 = arith.addf %60, %64 : vector<8x256xf32>
    %66 = arith.addf %0, %65 : vector<8x256xf32>
    %c0_22 = arith.constant 0 : index
    %c0_23 = arith.constant 0 : index
    %67 = vector.load %arg11[%c0_22, %c0_23] : memref<1x256xf32, #tpu.memory_space<vmem>>, vector<1x256xf32>
    %68 = vector.shape_cast %67 : vector<1x256xf32> to vector<256xf32>
    %c0_24 = arith.constant 0 : index
    %c0_25 = arith.constant 0 : index
    %69 = vector.load %arg12[%c0_24, %c0_25] : memref<1x256xf32, #tpu.memory_space<vmem>>, vector<1x256xf32>
    %70 = vector.shape_cast %69 : vector<1x256xf32> to vector<256xf32>
    %cst_26 = arith.constant dense<0.000000e+00> : vector<8xf32>
    %71 = vector.multi_reduction <add>, %66, %cst_26 [1] : vector<8x256xf32> to vector<8xf32>
    %72 = vector.shape_cast %71 : vector<8xf32> to vector<8x1xf32>
    %cst_27 = arith.constant 2.560000e+02 : f32
    %73 = vector.broadcast %cst_27 : f32 to vector<8x1xf32>
    %74 = arith.divf %72, %73 : vector<8x1xf32>
    %75 = vector.broadcast %74 : vector<8x1xf32> to vector<8x256xf32>
    %76 = arith.subf %66, %75 : vector<8x256xf32>
    %77 = arith.mulf %76, %76 : vector<8x256xf32>
    %cst_28 = arith.constant dense<0.000000e+00> : vector<8xf32>
    %78 = vector.multi_reduction <add>, %77, %cst_28 [1] : vector<8x256xf32> to vector<8xf32>
    %79 = vector.shape_cast %78 : vector<8xf32> to vector<8x1xf32>
    %cst_29 = arith.constant 2.560000e+02 : f32
    %80 = vector.broadcast %cst_29 : f32 to vector<8x1xf32>
    %81 = arith.divf %79, %80 : vector<8x1xf32>
    %cst_30 = arith.constant 9.99999997E-7 : f32
    %82 = vector.broadcast %cst_30 : f32 to vector<8x1xf32>
    %83 = arith.addf %81, %82 : vector<8x1xf32>
    %84 = math.rsqrt %83 : vector<8x1xf32>
    %85 = vector.broadcast %84 : vector<8x1xf32> to vector<8x256xf32>
    %86 = arith.mulf %76, %85 : vector<8x256xf32>
    %87 = vector.shape_cast %68 : vector<256xf32> to vector<1x256xf32>
    %88 = vector.broadcast %87 : vector<1x256xf32> to vector<8x256xf32>
    %89 = arith.mulf %86, %88 : vector<8x256xf32>
    %90 = vector.shape_cast %70 : vector<256xf32> to vector<1x256xf32>
    %91 = vector.broadcast %90 : vector<1x256xf32> to vector<8x256xf32>
    %92 = arith.addf %89, %91 : vector<8x256xf32>
    %93 = arith.truncf %92 : vector<8x256xf32> to vector<8x256xbf16>
    %c0_31 = arith.constant 0 : index
    %c0_32 = arith.constant 0 : index
    %94 = vector.load %arg7[%c0_31, %c0_32] : memref<256x256xbf16, #tpu.memory_space<vmem>>, vector<256x256xbf16>
    %cst_33 = arith.constant dense<0.000000e+00> : vector<8x256xf32>
    %95 = tpu.matmul %93, %94, %cst_33 {dimension_numbers = #tpu.dot_dimension_numbers<[1], [0], [0], [1], [0, 0, 1, 1], [], []>} : vector<8x256xbf16>, vector<256x256xbf16>, vector<8x256xf32> -> vector<8x256xf32>
    %c0_34 = arith.constant 0 : index
    %c0_35 = arith.constant 0 : index
    %96 = vector.load %arg8[%c0_34, %c0_35] : memref<1x256xf32, #tpu.memory_space<vmem>>, vector<1x256xf32>
    %97 = vector.shape_cast %96 : vector<1x256xf32> to vector<256xf32>
    %98 = vector.shape_cast %97 : vector<256xf32> to vector<1x256xf32>
    %99 = vector.broadcast %98 : vector<1x256xf32> to vector<8x256xf32>
    %100 = arith.addf %95, %99 : vector<8x256xf32>
    %cst_36 = arith.constant 0.000000e+00 : f32
    %101 = vector.broadcast %cst_36 : f32 to vector<8x256xf32>
    %102 = arith.maximumf %100, %101 : vector<8x256xf32>
    %103 = arith.truncf %102 : vector<8x256xf32> to vector<8x256xbf16>
    %c0_37 = arith.constant 0 : index
    %c0_38 = arith.constant 0 : index
    %104 = vector.load %arg9[%c0_37, %c0_38] : memref<256x256xbf16, #tpu.memory_space<vmem>>, vector<256x256xbf16>
    %cst_39 = arith.constant dense<0.000000e+00> : vector<8x256xf32>
    %105 = tpu.matmul %103, %104, %cst_39 {dimension_numbers = #tpu.dot_dimension_numbers<[1], [0], [0], [1], [0, 0, 1, 1], [], []>} : vector<8x256xbf16>, vector<256x256xbf16>, vector<8x256xf32> -> vector<8x256xf32>
    %c0_40 = arith.constant 0 : index
    %c0_41 = arith.constant 0 : index
    %106 = vector.load %arg10[%c0_40, %c0_41] : memref<1x256xf32, #tpu.memory_space<vmem>>, vector<1x256xf32>
    %107 = vector.shape_cast %106 : vector<1x256xf32> to vector<256xf32>
    %108 = vector.shape_cast %107 : vector<256xf32> to vector<1x256xf32>
    %109 = vector.broadcast %108 : vector<1x256xf32> to vector<8x256xf32>
    %110 = arith.addf %105, %109 : vector<8x256xf32>
    %111 = arith.addf %92, %110 : vector<8x256xf32>
    %c0_42 = arith.constant 0 : index
    %c0_43 = arith.constant 0 : index
    %112 = vector.load %arg13[%c0_42, %c0_43] : memref<1x256xf32, #tpu.memory_space<vmem>>, vector<1x256xf32>
    %113 = vector.shape_cast %112 : vector<1x256xf32> to vector<256xf32>
    %c0_44 = arith.constant 0 : index
    %c0_45 = arith.constant 0 : index
    %114 = vector.load %arg14[%c0_44, %c0_45] : memref<1x256xf32, #tpu.memory_space<vmem>>, vector<1x256xf32>
    %115 = vector.shape_cast %114 : vector<1x256xf32> to vector<256xf32>
    %cst_46 = arith.constant dense<0.000000e+00> : vector<8xf32>
    %116 = vector.multi_reduction <add>, %111, %cst_46 [1] : vector<8x256xf32> to vector<8xf32>
    %117 = vector.shape_cast %116 : vector<8xf32> to vector<8x1xf32>
    %cst_47 = arith.constant 2.560000e+02 : f32
    %118 = vector.broadcast %cst_47 : f32 to vector<8x1xf32>
    %119 = arith.divf %117, %118 : vector<8x1xf32>
    %120 = vector.broadcast %119 : vector<8x1xf32> to vector<8x256xf32>
    %121 = arith.subf %111, %120 : vector<8x256xf32>
    %122 = arith.mulf %121, %121 : vector<8x256xf32>
    %cst_48 = arith.constant dense<0.000000e+00> : vector<8xf32>
    %123 = vector.multi_reduction <add>, %122, %cst_48 [1] : vector<8x256xf32> to vector<8xf32>
    %124 = vector.shape_cast %123 : vector<8xf32> to vector<8x1xf32>
    %cst_49 = arith.constant 2.560000e+02 : f32
    %125 = vector.broadcast %cst_49 : f32 to vector<8x1xf32>
    %126 = arith.divf %124, %125 : vector<8x1xf32>
    %cst_50 = arith.constant 9.99999997E-7 : f32
    %127 = vector.broadcast %cst_50 : f32 to vector<8x1xf32>
    %128 = arith.addf %126, %127 : vector<8x1xf32>
    %129 = math.rsqrt %128 : vector<8x1xf32>
    %130 = vector.broadcast %129 : vector<8x1xf32> to vector<8x256xf32>
    %131 = arith.mulf %121, %130 : vector<8x256xf32>
    %132 = vector.shape_cast %113 : vector<256xf32> to vector<1x256xf32>
    %133 = vector.broadcast %132 : vector<1x256xf32> to vector<8x256xf32>
    %134 = arith.mulf %131, %133 : vector<8x256xf32>
    %135 = vector.shape_cast %115 : vector<256xf32> to vector<1x256xf32>
    %136 = vector.broadcast %135 : vector<1x256xf32> to vector<8x256xf32>
    %137 = arith.addf %134, %136 : vector<8x256xf32>
    %c0_51 = arith.constant 0 : index
    %c0_52 = arith.constant 0 : index
    %138 = vector.load %arg15[%c0_51, %c0_52] : memref<8x256xf32, #tpu.memory_space<vmem>>, vector<8x256xf32>
    tpu.vector_store %arg15[%c0_51, %c0_52], %137 {strides = array<i32>} : memref<8x256xf32, #tpu.memory_space<vmem>>, vector<8x256xf32>,
    return
  }
  func.func @transform_0(%arg0: i32) -> (i32, i32) {
    %c0_i32 = arith.constant 0 : i32
    %c0_i32_0 = arith.constant 0 : i32
    return %arg0, %c0_i32 : i32, i32
  }
  func.func @transform_1(%arg0: i32) -> (i32, i32) {
    %c0_i32 = arith.constant 0 : i32
    %c0_i32_0 = arith.constant 0 : i32
    %c0_i32_1 = arith.constant 0 : i32
    return %c0_i32, %c0_i32_0 : i32, i32
  }
  func.func @transform_2(%arg0: i32) -> (i32, i32) {
    %c0_i32 = arith.constant 0 : i32
    %c0_i32_0 = arith.constant 0 : i32
    %c0_i32_1 = arith.constant 0 : i32
    return %c0_i32, %c0_i32_0 : i32, i32
  }
  func.func @transform_3(%arg0: i32) -> (i32, i32) {
    %c0_i32 = arith.constant 0 : i32
    %c0_i32_0 = arith.constant 0 : i32
    %c0_i32_1 = arith.constant 0 : i32
    return %c0_i32, %c0_i32_0 : i32, i32
  }
  func.func @transform_4(%arg0: i32) -> (i32, i32) {
    %c0_i32 = arith.constant 0 : i32
    %c0_i32_0 = arith.constant 0 : i32
    %c0_i32_1 = arith.constant 0 : i32
    return %c0_i32, %c0_i32_0 : i32, i32
  }
  func.func @transform_5(%arg0: i32) -> (i32, i32) {
    %c0_i32 = arith.constant 0 : i32
    %c0_i32_0 = arith.constant 0 : i32
    %c0_i32_1 = arith.constant 0 : i32
    return %c0_i32, %c0_i32_0 : i32, i32
  }
  func.func @transform_6(%arg0: i32) -> (i32, i32) {
    %c0_i32 = arith.constant 0 : i32
    %c0_i32_0 = arith.constant 0 : i32
    %c0_i32_1 = arith.constant 0 : i32
    return %c0_i32, %c0_i32_0 : i32, i32
  }
  func.func @transform_7(%arg0: i32) -> (i32, i32) {
    %c0_i32 = arith.constant 0 : i32
    %c0_i32_0 = arith.constant 0 : i32
    %c0_i32_1 = arith.constant 0 : i32
    return %c0_i32, %c0_i32_0 : i32, i32
  }
  func.func @transform_8(%arg0: i32) -> (i32, i32) {
    %c0_i32 = arith.constant 0 : i32
    %c0_i32_0 = arith.constant 0 : i32
    %c0_i32_1 = arith.constant 0 : i32
    return %c0_i32, %c0_i32_0 : i32, i32
  }
  func.func @transform_9(%arg0: i32) -> (i32, i32) {
    %c0_i32 = arith.constant 0 : i32
    %c0_i32_0 = arith.constant 0 : i32
    %c0_i32_1 = arith.constant 0 : i32
    return %c0_i32, %c0_i32_0 : i32, i32
  }
  func.func @transform_10(%arg0: i32) -> (i32, i32) {
    %c0_i32 = arith.constant 0 : i32
    %c0_i32_0 = arith.constant 0 : i32
    %c0_i32_1 = arith.constant 0 : i32
    return %c0_i32, %c0_i32_0 : i32, i32
  }
  func.func @transform_11(%arg0: i32) -> (i32, i32) {
    %c0_i32 = arith.constant 0 : i32
    %c0_i32_0 = arith.constant 0 : i32
    %c0_i32_1 = arith.constant 0 : i32
    return %c0_i32, %c0_i32_0 : i32, i32
  }
  func.func @transform_12(%arg0: i32) -> (i32, i32) {
    %c0_i32 = arith.constant 0 : i32
    %c0_i32_0 = arith.constant 0 : i32
    %c0_i32_1 = arith.constant 0 : i32
    return %c0_i32, %c0_i32_0 : i32, i32
  }
  func.func @transform_13(%arg0: i32) -> (i32, i32) {
    %c0_i32 = arith.constant 0 : i32
    %c0_i32_0 = arith.constant 0 : i32
    %c0_i32_1 = arith.constant 0 : i32
    return %c0_i32, %c0_i32_0 : i32, i32
  }
  func.func @transform_14(%arg0: i32) -> (i32, i32) {
    %c0_i32 = arith.constant 0 : i32
    %c0_i32_0 = arith.constant 0 : i32
    return %arg0, %c0_i32 : i32, i32
  }
}

</mosaic_0001>

<bundles_post_ra>
// kernel: tpu_custom_call.1
= control target key start
LH: loop header
LB: loop body
LE: loop exit
PB: predicated region body
PF: predicated region fallthrough
CT: control target
= control target key end

     0   :  { %s4269_s0 = inlined_call_operand.hbm [shape: f32[16,256], index: 0, kind: input, shape index: {}]   ;;  %s4270_s1 = inlined_call_operand.hbm [shape: f32[8,8], index: 1, kind: input, shape index: {}]   ;;  %s4271_s2 = inlined_call_operand.hbm [shape: bf16[256,768], index: 2, kind: input, shape index: {}]   ;;  %s4272_s3 = inlined_call_operand.hbm [shape: f32[1,768], index: 3, kind: input, shape index: {}]   ;;  %s4273_s4 = inlined_call_operand.hbm [shape: bf16[256,256], index: 4, kind: input, shape index: {}]   ;;  %s4274_s5 = inlined_call_operand.vmem [shape: f32[1,256], index: 5, kind: input, shape index: {}]   ;;  %s4275_s6 = inlined_call_operand.hbm [shape: bf16[256,256], index: 6, kind: input, shape index: {}]   ;;  %s4276_s7 = inlined_call_operand.vmem [shape: f32[1,256], index: 7, kind: input, shape index: {}]   ;;  %s4277_s8 = inlined_call_operand.hbm [shape: bf16[256,256], index: 8, kind: input, shape index: {}]   ;;  %s4278_s9 = inlined_call_operand.vmem [shape: f32[1,256], index: 9, kind: input, shape index: {}]   ;;  %s4279_s10 = inlined_call_operand.vmem [shape: f32[1,256], index: 10, kind: input, shape index: {}]   ;;  %s4280_s11 = inlined_call_operand.vmem [shape: f32[1,256], index: 11, kind: input, shape index: {}]   ;;  %s4281_s12 = inlined_call_operand.hbm [shape: f32[1,256], index: 12, kind: input, shape index: {}]   ;;  %s4282_s13 = inlined_call_operand.vmem [shape: f32[1,256], index: 13, kind: input, shape index: {}]   ;;  %s4283_s14 = inlined_call_operand.hbm [shape: f32[16,256], index: 14, kind: output, shape index: {}]  }
   0x1   :  { %4285 = sst [smem:[#allocation23_spill]] %s4270_s1 }
   0x2   :  { %4286 = sst [smem:[#allocation24_spill]] %s4271_s2 }
   0x3   :  { %4287 = sst [smem:[#allocation25_spill]] %s4272_s3 }
   0x4   :  { %4288 = sst [smem:[#allocation26_spill]] %s4273_s4 }
   0x5   :  { %4289 = sst [smem:[#allocation27_spill]] %s4275_s6 }
   0x6   :  { %4290 = sst [smem:[#allocation28_spill]] %s4278_s9 }
   0x7   :  { %4291 = sst [smem:[#allocation29_spill]] %s4282_s13 }
   0x8   :  { %4292 = sst [smem:[#allocation30_spill]] %s4283_s14 }
   0x9   :  { %19 = vsyncpa [#allocation3], 0 }
   0xa   :  { %21 = vsyncpa [#allocation3 + $0x1], 0 }
   0xb   :  { %22 = vsyncpa [#allocation6], 0 }
   0xc   :  { %23 = vsyncpa [#allocation9], 0 }
   0xd   :  { %24 = vsyncpa [#allocation12], 0 }
   0xe   :  { %25 = vsyncpa [#allocation15], 0 }
   0xf   :  { %26 = vsyncpa [#allocation4], 0 }
  0x10   :  { %28 = vsyncpa [#allocation4 + $0x1], 0  ;;  %s3996_s29 = smov 0   ;;  %s3998_s30 = smov 0  }
  0x11   :  { %s4000_s15 = smov 0   ;;  %s4002_s16 = smov 0  }
  0x12 LB: > { %s4293_s1 = sld [smem:[#allocation23_spill]]  ;;  %s4020_s20 = sadd.s32 4294967295, %s3907_s16   ;;  %s3907_s16 = sphi %s4002_s16, %s4311_s16   ;;  %s3903_s15 = sphi %s4000_s15, %s4310_s15   ;;  %s3899_s30 = sphi %s3998_s30, %s4309_s30   ;;  %s3895_s29 = sphi %s3996_s29, %s4308_s29  }
  0x13   : > { %p2456_p0 = scmp.ge.s32.totalorder %s3907_s16, 1  ;;  %p55_p1 = scmp.eq.s32.totalorder %s4020_s20, 0 }
  0x14   : > { %p364_p2 = scmp.lt.s32.totalorder %s3907_s16, 3  ;;  %s3909_s22 = smov [#allocation5]  }
  0x15   : > { %s378_s23 = sshll.u32 %s3909_s22, 4  ;;  %s4295_s3 = sld [smem:[#allocation25_spill]]  ;;  %s379_s23 = int_to_ptr.vmem [resolvable:$true] %s378_s23 }
  0x16   : > { %p4025_p3 = pnand %p2456_p0, %p364_p2  ;;  %s3910_s28 = smov [#allocation8]  }
  0x17   : > { %s404_s17 = sshll.u32 %s3910_s28, 4  ;;  %s4297_s6 = sld [smem:[#allocation27_spill]]  ;;  %s405_s17 = int_to_ptr.vmem [resolvable:$true] %s404_s17 }
  0x18   : > { %s376_s19 = sshll.u32 %s4293_s1, 4  ;;  %p3479_p5 = pneg %p4025_p3  ;;  %s377_s19 = int_to_ptr.hbm [resolvable:$true] %s376_s19 }
  0x19   : > { %s3911_s25 = smov [#allocation11]   ;;  %s4298_s2 = sld [smem:[#allocation24_spill]] }
  0x1a   : > { %p4037_p6 = pnand %p3479_p5, %p55_p1  ;;  %s432_s1 = sshll.u32 %s3911_s25, 4  ;;  %s433_s1 = int_to_ptr.vmem [resolvable:$true] %s432_s1 }
  0x1b   : > { %s402_s26 = sshll.u32 %s4295_s3, 4  ;;  %s3912_s9 = smov 128   ;;  %s403_s26 = int_to_ptr.hbm [resolvable:$true] %s402_s26 }
  0x1c   : > { %3482 = dma.hbm_to_vmem [thread:$0]  (!%p4037_p6), %s377_s19, 128, %s379_s23, [#allocation6]  }
  0x1d   : > { %3488 = dma.hbm_to_vmem [thread:$0]  (!%p4037_p6), %s403_s26, 96, %s405_s17, [#allocation9]  }
  0x1e   : > { %s430_s24 = sshll.u32 %s4297_s6, 4  ;;  %s3913_s28 = smov 8   ;;  %s431_s24 = int_to_ptr.hbm [resolvable:$true] %s430_s24 }
  0x1f   : > { %s387_s13 = sshll.u32 %s4298_s2, 4  ;;  %s3914_s19 = smov [#allocation7]   ;;  %s388_s13 = int_to_ptr.hbm [resolvable:$true] %s387_s13 }
  0x20   : > { %3494 = dma.hbm_to_vmem [thread:$0]  (!%p4037_p6), %s431_s24, 4096, %s433_s1, [#allocation12], %s3912_s9, %s3912_s9, %s3913_s28  }
  0x21   : > { %s389_s23 = sshll.u32 %s3914_s19, 4  ;;  %s3915_s26 = smov 384   ;;  %s390_s23 = int_to_ptr.vmem [resolvable:$true] %s389_s23 }
  0x22   : > { %s3916_s17 = smov 24   ;;  %s4299_s4 = sld [smem:[#allocation26_spill]] }
  0x23   : > { %3485 = dma.hbm_to_vmem [thread:$0]  (!%p4037_p6), %s388_s13, 12288, %s390_s23, [#allocation6], %s3915_s26, %s3915_s26, %s3916_s17  }
  0x24   : > { %s3917_s3 = smov [#allocation10]   ;;  %s447_s19 = sshll.u32 %s4277_s8, 4  ;;  %s448_s19 = int_to_ptr.hbm [resolvable:$true] %s447_s19 }
  0x25   : > { %s415_s14 = sshll.u32 %s3917_s3, 4  ;;  %s3918_s13 = smov [#allocation13]   ;;  %s416_s14 = int_to_ptr.vmem [resolvable:$true] %s415_s14 }
  0x26   : > { %s449_s23 = sshll.u32 %s3918_s13, 4  ;;  %s471_s18 = sshll.u32 %s4281_s12, 4  ;;  %s450_s23 = int_to_ptr.vmem [resolvable:$true] %s449_s23  ;;  %s472_s18 = int_to_ptr.hbm [resolvable:$true] %s471_s18 }
  0x27   : > { %3497 = dma.hbm_to_vmem [thread:$0]  (!%p4037_p6), %s448_s19, 4096, %s450_s23, [#allocation12], %s3912_s9, %s3912_s9, %s3913_s28  }
  0x28   : > { %s413_s25 = sshll.u32 %s4299_s4, 4  ;;  %s3919_s22 = smov [#allocation14]   ;;  %s414_s25 = int_to_ptr.hbm [resolvable:$true] %s413_s25 }
  0x29   : > { %3491 = dma.hbm_to_vmem [thread:$0]  (!%p4037_p6), %s414_s25, 4096, %s416_s14, [#allocation9], %s3912_s9, %s3912_s9, %s3913_s28  }
  0x2a   : > { %s473_s25 = sshll.u32 %s3919_s22, 4  ;;  %s2455_s3 = sadd.s32 4294967294, %s3907_s16   ;;  %s474_s25 = int_to_ptr.vmem [resolvable:$true] %s473_s25 }
  0x2b   : > { %3500 = dma.hbm_to_vmem [thread:$0]  (!%p4037_p6), %s472_s18, 32, %s474_s25, [#allocation15]  }
  0x2c   : > { %s4072_s14 = sadd.s32 1, %s3907_s16   ;;  %s41_s1 = sadd.s32 1, %s3903_s15 }
  0x2d   : > { %s38_s24 = ssub.s32 %s3907_s16, %s4072_s14  ;;  %p48_p7 = scmp.ne.s32.totalorder %s3903_s15, %s3899_s30 }
  0x2e   : > { %p39_p8 = scmp.eq.s32.totalorder %s38_s24, 0  ;;  %p49_p9 = scmp.eq.s32.totalorder %s3907_s16, 0 }
  0x2f   : > { %p54_p10 = scmp.ne.s32.totalorder %s3899_s30, %s3895_s29  ;;  %p351_p11 = scmp.eq.s32.totalorder %s4020_s20, 1 }
  0x30   : > { %s4084_s9 = scalar_select %p39_p8, %s3903_s15, %s41_s1  }
  0x31   : > { %p4088_p12 = por %p55_p1, %p54_p10  ;;  %p4092_p13 = por %p351_p11, %p48_p7 }
  0x32   : > { %p357_p0 = scmp.eq.s32.totalorder %s2455_s3, 1  ;;  %p50_p2 = por %p49_p9, %p48_p7 }
  0x33   : > { %s487_s19 = sand.u32 1, %s3903_s15   ;;  %p3516_p6 = scmp.lt.s32.totalorder %s3907_s16, 2 }
  0x34   : > { %p4097_p5 = por %p357_p0, %p54_p10  ;;  %s2465_s23 = sshll.u32 %s487_s19, 4 }
  0x35   : > { %s3253_s26 = sshll.u32 %s3907_s16, 4  ;;  %s491_s1 = scalar_lea.vmem [#allocation2], %s2465_s23 }
  0x36   : > { %s496_s22 = scalar_lea.hbm %s4269_s0, %s3253_s26  ;;  %s500_s24 = sshll.u32 %s491_s1, 4  ;;  %s501_s24 = int_to_ptr.vmem [resolvable:$true] %s500_s24 }
  0x37   : > { %s498_s25 = sshll.u32 %s496_s22, 4  ;;  %p4106_p8 = pnand %p3516_p6, %p50_p2  ;;  %s499_s25 = int_to_ptr.hbm [resolvable:$true] %s498_s25 }
  0x38   : > { %s488_s2 = scalar_lea.sflag [#allocation3], %s487_s19  ;;  %s3795_s4 = sshra.s32 %s499_s25, 4  ;;  %s3796_s4 = int_to_ptr.hbm [resolvable:$true] %s3795_s4 }
  0x39   : > { %s3797_s6 = scalar_lea.hbm %s3796_s4, 16  ;;  %p3799_p9 = pneg %p4106_p8 }
  0x3a   : > { %p3798_p7 = scmp.ne.s32.totalorder %s3796_s4, %s3797_s6  ;;  %s3802_s23 = scalar_lea.hbm %s4269_s0, 32 }
  0x3b   : > { %p3803_p0 = scmp.lt.s32.totalorder %s3796_s4, %s4269_s0  ;;  %p3804_p2 = scmp.lt.s32.totalorder %s3802_s23, %s3797_s6 }
  0x3c   : > { %p3800_p10 = pnand %p3799_p9, %p3798_p7 }
  0x3d   : > { %p3805_p6 = por %p3804_p2, %p3803_p0 }
  0x3e   : > { %p3801_p11 = pneg %p3800_p10 }
  0x40   : > { %p3806_p4 = pnand %p3805_p6, %p3801_p11 }
  0x42   : > { %3809 = shalt.err (!%p3806_p4)
}
  0x43   : > { %3504 = dma.hbm_to_vmem [thread:$0]  (!%p4106_p8), %s499_s25, 256, %s501_s24, %s488_s2  }
  0x44   : > { %509 = sbr.rel (%p4025_p3) target bundleno = 1783 (0x6f7), region = 76  ;;  %s4123_s19 = sand.u32 (!%p4025_p3), 1, %s3899_s30  }
  0x45   : > { %s2469_s1 = sshll.u32 (!%p4025_p3), %s4123_s19, 4  ;;  %s512_s26 = scalar_lea.sflag (!%p4025_p3), [#allocation3], %s4123_s19 }
  0x46   : > { %s4129_s4 = scalar_lea.vmem (!%p4025_p3), [#allocation2], %s2469_s1 }
  0x49   : > { %3870 = dma.done.wait (%p4088_p12), %s512_s26, 256  }
  0x4a   : > { %3872 = vsyncadd (%p4088_p12), %s512_s26, 4294967040 }
  0x4b   : > { %3874 = dma.done.wait (%p55_p1), [#allocation6], 12416  }
  0x4c   : > { %3876 = vsyncadd (%p55_p1), [#allocation6], 4294954880 }
  0x4d   : > { %3878 = dma.done.wait (%p55_p1), [#allocation9], 4192  }
  0x4e   : > { %3880 = vsyncadd (%p55_p1), [#allocation9], 4294963104 }
  0x4f   : > { %3882 = dma.done.wait (%p55_p1), [#allocation12], 8192  }
  0x50   : > { %3884 = vsyncadd (%p55_p1), [#allocation12], 4294959104 }
  0x51   : > { %3886 = dma.done.wait (%p55_p1), [#allocation15], 32  }
  0x52   : > { %3888 = vsyncadd (%p55_p1), [#allocation15], 4294967264  ;;  %v2648_v0 = vld [vmem:[#allocation7 + $0x150] sm:$0xf]  ;;  %v3299_v1 = vld [vmem:[#allocation7 + $0x164] sm:$0xf0] }
  0x53   : > { %v3296_v2 = vld [vmem:[#allocation7 + $0x154] sm:$0xf]  ;;  %v2649_v3 = vor.u32 %v3299_v1, %v2648_v0  ;;  %v2650_v4 = vld [vmem:[#allocation7 + $0x168] sm:$0xf0]  ;;  %v2840_v9 = vld [vmem:[#allocation7 + $0x2d0] sm:$0xf] }
  0x54   : > { %v3344_v5 = vld [vmem:[#allocation7 + $0x2d4] sm:$0xf]  ;;  %v2842_v6 = vld [vmem:[#allocation7 + $0x2e8] sm:$0xf0]  ;;  %v2653_v7 = vor.u32 %v3296_v2, %v2650_v4  ;;  %v3347_v10 = vld [vmem:[#allocation7 + $0x2e4] sm:$0xf0] }
  0x55   : > { %v2845_v8 = vor.u32 %v3344_v5, %v2842_v6  ;;  %v2624_v11 = vld [vmem:[#allocation7 + $0x120] sm:$0xf]  ;;  %1191 = vmatpush.bf16.msra.mxu0 %v2649_v3  ;;  %v2841_v12 = vor.u32 %v3347_v10, %v2840_v9  ;;  %v3293_v13 = vld [vmem:[#allocation7 + $0x134] sm:$0xf0]  ;;  %v3290_v14 = vld [vmem:[#allocation7 + $0x124] sm:$0xf] }
  0x56   : > { %v2626_v15 = vld [vmem:[#allocation7 + $0x138] sm:$0xf0]  ;;  %1217 = vmatpush.bf16.msra.mxu2 %v2653_v7  ;;  %v2625_v16 = vor.u32 %v3293_v13, %v2624_v11  ;;  %v3338_v18 = vld [vmem:[#allocation7 + $0x2a4] sm:$0xf]  ;;  %v2816_v20 = vld [vmem:[#allocation7 + $0x2a0] sm:$0xf] }
  0x57   : > { %1230 = vmatpush.bf16.msra.mxu3 %v2845_v8  ;;  %v2629_v17 = vor.u32 %v3290_v14, %v2626_v15  ;;  %v2818_v19 = vld [vmem:[#allocation7 + $0x2b8] sm:$0xf0]  ;;  %1204 = vmatpush.bf16.msra.mxu1 %v2841_v12  ;;  %v3341_v22 = vld [vmem:[#allocation7 + $0x2b4] sm:$0xf0]  ;;  %v2600_v23 = vld [vmem:[#allocation7 + $0xf0] sm:$0xf] }
  0x58   : > { %v2821_v21 = vor.u32 %v3338_v18, %v2818_v19  ;;  %v3287_v24 = vld [vmem:[#allocation7 + $0x104] sm:$0xf0]  ;;  %v2817_v25 = vor.u32 %v3341_v22, %v2816_v20  ;;  %v3284_v26 = vld [vmem:[#allocation7 + $0xf4] sm:$0xf]  ;;  %v2602_v27 = vld [vmem:[#allocation7 + $0x108] sm:$0xf0] }
  0x59   : > { %v3332_v28 = vld [vmem:[#allocation7 + $0x274] sm:$0xf]  ;;  %1192 = vmatpush.bf16.msra.mxu0 %v2625_v16  ;;  %v2601_v29 = vor.u32 %v3287_v24, %v2600_v23  ;;  %v2794_v30 = vld [vmem:[#allocation7 + $0x288] sm:$0xf0]  ;;  %v2792_v31 = vld [vmem:[#allocation7 + $0x270] sm:$0xf]  ;;  %v2605_v33 = vor.u32 %v3284_v26, %v2602_v27 }
  0x5a   : > { %v3335_v32 = vld [vmem:[#allocation7 + $0x284] sm:$0xf0]  ;;  %1218 = vmatpush.bf16.msra.mxu2 %v2629_v17  ;;  %v2797_v34 = vor.u32 %v3332_v28, %v2794_v30  ;;  %v2576_v35 = vld [vmem:[#allocation7 + $0xc0] sm:$0xf]  ;;  %v3281_v36 = vld [vmem:[#allocation7 + $0xd4] sm:$0xf0] }
  0x5b   : > { %1231 = vmatpush.bf16.msra.mxu3 %v2821_v21  ;;  %v3278_v37 = vld [vmem:[#allocation7 + $0xc4] sm:$0xf]  ;;  %1205 = vmatpush.bf16.msra.mxu1 %v2817_v25  ;;  %v2793_v38 = vor.u32 %v3335_v32, %v2792_v31  ;;  %v2578_v39 = vld [vmem:[#allocation7 + $0xd8] sm:$0xf0]  ;;  %v2768_v42 = vld [vmem:[#allocation7 + $0x240] sm:$0xf]  ;;  %v2577_v44 = vor.u32 %v3281_v36, %v2576_v35 }
  0x5c   : > { %v3326_v40 = vld [vmem:[#allocation7 + $0x244] sm:$0xf]  ;;  %v2770_v41 = vld [vmem:[#allocation7 + $0x258] sm:$0xf0]  ;;  %v3329_v43 = vld [vmem:[#allocation7 + $0x254] sm:$0xf0]  ;;  %v2581_v45 = vor.u32 %v3278_v37, %v2578_v39 }
  0x5d   : > { %1193 = vmatpush.bf16.msra.mxu0 %v2601_v29  ;;  %v2773_v46 = vor.u32 %v3326_v40, %v2770_v41  ;;  %v2552_v47 = vld [vmem:[#allocation7 + $0x90] sm:$0xf]  ;;  %v3275_v48 = vld [vmem:[#allocation7 + $0xa4] sm:$0xf0]  ;;  %v3272_v49 = vld [vmem:[#allocation7 + $0x94] sm:$0xf]  ;;  %v2769_v50 = vor.u32 %v3329_v43, %v2768_v42 }
  0x5e   : > { %1219 = vmatpush.bf16.msra.mxu2 %v2605_v33  ;;  %v2554_v51 = vld [vmem:[#allocation7 + $0xa8] sm:$0xf0]  ;;  %v3320_v52 = vld [vmem:[#allocation7 + $0x214] sm:$0xf]  ;;  %v2744_v54 = vld [vmem:[#allocation7 + $0x210] sm:$0xf]  ;;  %v2553_v56 = vor.u32 %v3275_v48, %v2552_v47 }
  0x5f   : > { %1232 = vmatpush.bf16.msra.mxu3 %v2797_v34  ;;  %1206 = vmatpush.bf16.msra.mxu1 %v2793_v38  ;;  %v2746_v53 = vld [vmem:[#allocation7 + $0x228] sm:$0xf0]  ;;  %v3323_v55 = vld [vmem:[#allocation7 + $0x224] sm:$0xf0]  ;;  %v2557_v57 = vor.u32 %v3272_v49, %v2554_v51  ;;  %v2528_v59 = vld [vmem:[#allocation7 + $0x60] sm:$0xf] }
  0x60   : > { %v2749_v58 = vor.u32 %v3320_v52, %v2746_v53  ;;  %v3269_v60 = vld [vmem:[#allocation7 + $0x74] sm:$0xf0]  ;;  %v3266_v61 = vld [vmem:[#allocation7 + $0x64] sm:$0xf]  ;;  %v2745_v62 = vor.u32 %v3323_v55, %v2744_v54  ;;  %v2530_v63 = vld [vmem:[#allocation7 + $0x78] sm:$0xf0] }
  0x61   : > { %1194 = vmatpush.bf16.msra.mxu0 %v2577_v44  ;;  %v3314_v0 = vld [vmem:[#allocation7 + $0x1e4] sm:$0xf]  ;;  %v2722_v1 = vld [vmem:[#allocation7 + $0x1f8] sm:$0xf0]  ;;  %v2720_v2 = vld [vmem:[#allocation7 + $0x1e0] sm:$0xf]  ;;  %v2529_v4 = vor.u32 %v3269_v60, %v2528_v59  ;;  %v2533_v5 = vor.u32 %v3266_v61, %v2530_v63 }
  0x62   : > { %1220 = vmatpush.bf16.msra.mxu2 %v2581_v45  ;;  %v3317_v3 = vld [vmem:[#allocation7 + $0x1f4] sm:$0xf0]  ;;  %v2725_v6 = vor.u32 %v3314_v0, %v2722_v1  ;;  %v2504_v7 = vld [vmem:[#allocation7 + $0x30] sm:$0xf]  ;;  %v3263_v8 = vld [vmem:[#allocation7 + $0x44] sm:$0xf0] }
  0x63   : > { %1233 = vmatpush.bf16.msra.mxu3 %v2773_v46  ;;  %1207 = vmatpush.bf16.msra.mxu1 %v2769_v50  ;;  %v3260_v9 = vld [vmem:[#allocation7 + $0x34] sm:$0xf]  ;;  %v2721_v10 = vor.u32 %v3317_v3, %v2720_v2  ;;  %v2506_v11 = vld [vmem:[#allocation7 + $0x48] sm:$0xf0]  ;;  %v2696_v14 = vld [vmem:[#allocation7 + $0x1b0] sm:$0xf]  ;;  %v2505_v16 = vor.u32 %v3263_v8, %v2504_v7 }
  0x64   : > { %v3308_v12 = vld [vmem:[#allocation7 + $0x1b4] sm:$0xf]  ;;  %v2698_v13 = vld [vmem:[#allocation7 + $0x1c8] sm:$0xf0]  ;;  %v3311_v15 = vld [vmem:[#allocation7 + $0x1c4] sm:$0xf0]  ;;  %v2509_v19 = vor.u32 %v3260_v9, %v2506_v11 }
  0x65   : > { %1195 = vmatpush.bf16.msra.mxu0 %v2553_v56  ;;  %v2480_v17 = vld [vmem:[#allocation7] sm:$0xf]  ;;  %v3257_v18 = vld [vmem:[#allocation7 + $0x14] sm:$0xf0]  ;;  %v2701_v20 = vor.u32 %v3308_v12, %v2698_v13  ;;  %v3254_v21 = vld [vmem:[#allocation7 + $0x4] sm:$0xf]  ;;  %v2697_v24 = vor.u32 %v3311_v15, %v2696_v14 }
  0x66   : > { %1221 = vmatpush.bf16.msra.mxu2 %v2557_v57  ;;  %v2482_v22 = vld [vmem:[#allocation7 + $0x18] sm:$0xf0]  ;;  %v3302_v23 = vld [vmem:[#allocation7 + $0x184] sm:$0xf]  ;;  %v2656_v26 = vld [vmem:[#allocation7 + $0x158] sm:$0xf]  ;;  %v2481_v31 = vor.u32 %v3257_v18, %v2480_v17 }
  0x67   : > { %1234 = vmatpush.bf16.msra.mxu3 %v2749_v58  ;;  %1208 = vmatpush.bf16.msra.mxu1 %v2745_v62  ;;  %v2674_v25 = vld [vmem:[#allocation7 + $0x198] sm:$0xf0]  ;;  %v3300_v27 = vld [vmem:[#allocation7 + $0x16c] sm:$0xf0]  ;;  %v2658_v29 = vld [vmem:[#allocation7 + $0x170] sm:$0xf0]  ;;  %v2485_v35 = vor.u32 %v3254_v21, %v2482_v22 }
  0x68   : > { %v3297_v28 = vld [vmem:[#allocation7 + $0x15c] sm:$0xf]  ;;  %v2850_v32 = vld [vmem:[#allocation7 + $0x2f0] sm:$0xf0]  ;;  %v2672_v33 = vld [vmem:[#allocation7 + $0x180] sm:$0xf]  ;;  %v2677_v36 = vor.u32 %v3302_v23, %v2674_v25  ;;  %v2657_v40 = vor.u32 %v3300_v27, %v2656_v26 }
  0x69   : > { %1196 = vmatpush.bf16.msra.mxu0 %v2529_v4  ;;  %v3345_v30 = vld [vmem:[#allocation7 + $0x2dc] sm:$0xf]  ;;  %v3305_v34 = vld [vmem:[#allocation7 + $0x194] sm:$0xf0]  ;;  %v3348_v38 = vld [vmem:[#allocation7 + $0x2ec] sm:$0xf0]  ;;  %v2661_v41 = vor.u32 %v3297_v28, %v2658_v29 }
  0x6a   : > { %1222 = vmatpush.bf16.msra.mxu2 %v2533_v5  ;;  %v2848_v37 = vld [vmem:[#allocation7 + $0x2d8] sm:$0xf]  ;;  %v2632_v42 = vld [vmem:[#allocation7 + $0x128] sm:$0xf]  ;;  %v598_v43 = vld [vmem:[%s4129_s4 + $0x8] sm:$0xff]  ;;  %v2853_v44 = vor.u32 %v3345_v30, %v2850_v32  ;;  %v2673_v45 = vor.u32 %v3305_v34, %v2672_v33  ;;  %vm1382_vm0 = vcmask 1043456  }
  0x6b   : > { %1235 = vmatpush.bf16.msra.mxu3 %v2725_v6  ;;  %1209 = vmatpush.bf16.msra.mxu1 %v2721_v10  ;;  %v597_v39 = vld [vmem:[%s4129_s4] sm:$0xff]  ;;  %v3294_v46 = vld [vmem:[#allocation7 + $0x13c] sm:$0xf0]  ;;  %v2634_v48 = vld [vmem:[#allocation7 + $0x140] sm:$0xf0]  ;;  %v2849_v49 = vor.u32 %v3348_v38, %v2848_v37  ;;  %v4155_v55 = vpack.c.bf16 %v598_v43, %v598_v43  ;;  %vm1366_vm1 = vcmask 64512  }
  0x6c   : > { %v3291_v47 = vld [vmem:[#allocation7 + $0x12c] sm:$0xf]  ;;  %v2826_v51 = vld [vmem:[#allocation7 + $0x2c0] sm:$0xf0]  ;;  %v4153_v52 = vpack.c.bf16 %v597_v39, %v597_v39  ;;  %v2824_v53 = vld [vmem:[#allocation7 + $0x2a8] sm:$0xf]  ;;  %v2633_v56 = vor.u32 %v3294_v46, %v2632_v42 }
  0x6d   : > { %1197 = vmatpush.bf16.msra.mxu0 %v2505_v16  ;;  %v3339_v50 = vld [vmem:[#allocation7 + $0x2ac] sm:$0xf]  ;;  %v3342_v54 = vld [vmem:[#allocation7 + $0x2bc] sm:$0xf0]  ;;  %v2637_v57 = vor.u32 %v3291_v47, %v2634_v48  ;;  %v2608_v58 = vld [vmem:[#allocation7 + $0xf8] sm:$0xf] }
  0x6e   : > { %1223 = vmatpush.bf16.msra.mxu2 %v2509_v19  ;;  %v2829_v59 = vor.u32 %v3339_v50, %v2826_v51  ;;  %v3288_v60 = vld [vmem:[#allocation7 + $0x10c] sm:$0xf0]  ;;  %v3285_v61 = vld [vmem:[#allocation7 + $0xfc] sm:$0xf]  ;;  %v2610_v62 = vld [vmem:[#allocation7 + $0x110] sm:$0xf0]  ;;  %v2825_v63 = vor.u32 %v3342_v54, %v2824_v53 }
  0x6f   : > { %1236 = vmatpush.bf16.msra.mxu3 %v2701_v20  ;;  %1210 = vmatpush.bf16.msra.mxu1 %v2697_v24  ;;  %v3333_v0 = vld [vmem:[#allocation7 + $0x27c] sm:$0xf]  ;;  %v2802_v1 = vld [vmem:[#allocation7 + $0x290] sm:$0xf0]  ;;  %v2800_v2 = vld [vmem:[#allocation7 + $0x278] sm:$0xf]  ;;  %v2609_v4 = vor.u32 %v3288_v60, %v2608_v58  ;;  %v2613_v5 = vor.u32 %v3285_v61, %v2610_v62 }
  0x70   : > { %v3336_v3 = vld [vmem:[#allocation7 + $0x28c] sm:$0xf0]  ;;  %v2584_v6 = vld [vmem:[#allocation7 + $0xc8] sm:$0xf]  ;;  %v2805_v7 = vor.u32 %v3333_v0, %v2802_v1  ;;  %v3282_v8 = vld [vmem:[#allocation7 + $0xdc] sm:$0xf0] }
  0x71   : > { %1198 = vmatpush.bf16.msra.mxu0 %v2481_v31  ;;  %v3279_v9 = vld [vmem:[#allocation7 + $0xcc] sm:$0xf]  ;;  %v2586_v10 = vld [vmem:[#allocation7 + $0xe0] sm:$0xf0]  ;;  %v2801_v11 = vor.u32 %v3336_v3, %v2800_v2  ;;  %v2776_v14 = vld [vmem:[#allocation7 + $0x248] sm:$0xf]  ;;  %v2585_v16 = vor.u32 %v3282_v8, %v2584_v6 }
  0x72   : > { %1224 = vmatpush.bf16.msra.mxu2 %v2485_v35  ;;  %v3327_v12 = vld [vmem:[#allocation7 + $0x24c] sm:$0xf]  ;;  %v2778_v13 = vld [vmem:[#allocation7 + $0x260] sm:$0xf0]  ;;  %v3330_v15 = vld [vmem:[#allocation7 + $0x25c] sm:$0xf0]  ;;  %v2589_v17 = vor.u32 %v3279_v9, %v2586_v10 }
  0x73   : > { %1237 = vmatpush.bf16.msra.mxu3 %v2677_v36  ;;  %1211 = vmatpush.bf16.msra.mxu1 %v2673_v45  ;;  %v2560_v18 = vld [vmem:[#allocation7 + $0x98] sm:$0xf]  ;;  %v2781_v19 = vor.u32 %v3327_v12, %v2778_v13  ;;  %v3276_v20 = vld [vmem:[#allocation7 + $0xac] sm:$0xf0]  ;;  %v3273_v21 = vld [vmem:[#allocation7 + $0x9c] sm:$0xf]  ;;  %v2777_v23 = vor.u32 %v3330_v15, %v2776_v14 }
  0x74   : > { %1199 = vmatmul.bf16.vlgmr.msra.gmra.mxu0 %v4153_v52  ;;  %v2562_v22 = vld [vmem:[#allocation7 + $0xb0] sm:$0xf0]  ;;  %v3321_v24 = vld [vmem:[#allocation7 + $0x21c] sm:$0xf]  ;;  %v2752_v26 = vld [vmem:[#allocation7 + $0x218] sm:$0xf]  ;;  %v2561_v28 = vor.u32 %v3276_v20, %v2560_v18 }
  0x75   : > { %1243 = vmatpush.bf16.msrb.mxu0 %v2657_v40  ;;  %1225 = vmatmul.bf16.vlgmr.msra.gmra.mxu2 %v4153_v52  ;;  %v2754_v25 = vld [vmem:[#allocation7 + $0x230] sm:$0xf0]  ;;  %v3324_v27 = vld [vmem:[#allocation7 + $0x22c] sm:$0xf0]  ;;  %v2565_v29 = vor.u32 %v3273_v21, %v2562_v22  ;;  %v2536_v30 = vld [vmem:[#allocation7 + $0x68] sm:$0xf] }
  0x76   : > { %1269 = vmatpush.bf16.msrb.mxu2 %v2661_v41  ;;  %1238 = vmatmul.bf16.vlgmr.msra.gmra.mxu3 %v4155_v55  ;;  %v2757_v31 = vor.u32 %v3321_v24, %v2754_v25  ;;  %v3270_v32 = vld [vmem:[#allocation7 + $0x7c] sm:$0xf0]  ;;  %v3267_v33 = vld [vmem:[#allocation7 + $0x6c] sm:$0xf]  ;;  %v2538_v34 = vld [vmem:[#allocation7 + $0x80] sm:$0xf0]  ;;  %v2753_v35 = vor.u32 %v3324_v27, %v2752_v26 }
  0x77   : > { %1282 = vmatpush.bf16.msrb.mxu3 %v2853_v44  ;;  %1256 = vmatpush.bf16.msrb.mxu1 %v2849_v49  ;;  %v3315_v36 = vld [vmem:[#allocation7 + $0x1ec] sm:$0xf]  ;;  %v2730_v37 = vld [vmem:[#allocation7 + $0x200] sm:$0xf0]  ;;  %v2728_v38 = vld [vmem:[#allocation7 + $0x1e8] sm:$0xf]  ;;  %v2537_v40 = vor.u32 %v3270_v32, %v2536_v30  ;;  %v2541_v41 = vor.u32 %v3267_v33, %v2538_v34 }
  0x78   : > { %1212 = vmatmul.bf16.vlgmr.msra.gmra.mxu1 %v4155_v55  ;;  %v3318_v39 = vld [vmem:[#allocation7 + $0x1fc] sm:$0xf0]  ;;  %v2512_v42 = vld [vmem:[#allocation7 + $0x38] sm:$0xf]  ;;  %v2733_v43 = vor.u32 %v3315_v36, %v2730_v37  ;;  %v3264_v44 = vld [vmem:[#allocation7 + $0x4c] sm:$0xf0] }
  0x79   : > { %1244 = vmatpush.bf16.msrb.mxu0 %v2633_v56  ;;  %v3261_v45 = vld [vmem:[#allocation7 + $0x3c] sm:$0xf]  ;;  %v2514_v46 = vld [vmem:[#allocation7 + $0x50] sm:$0xf0]  ;;  %v2729_v47 = vor.u32 %v3318_v39, %v2728_v38  ;;  %v2704_v50 = vld [vmem:[#allocation7 + $0x1b8] sm:$0xf]  ;;  %v2513_v53 = vor.u32 %v3264_v44, %v2512_v42 }
  0x7a   : > { %1270 = vmatpush.bf16.msrb.mxu2 %v2637_v57  ;;  %v3309_v48 = vld [vmem:[#allocation7 + $0x1bc] sm:$0xf]  ;;  %v2706_v49 = vld [vmem:[#allocation7 + $0x1d0] sm:$0xf0]  ;;  %v3312_v51 = vld [vmem:[#allocation7 + $0x1cc] sm:$0xf0]  ;;  %v2517_v54 = vor.u32 %v3261_v45, %v2514_v46 }
  0x7b   : > { %1283 = vmatpush.bf16.msrb.mxu3 %v2829_v59  ;;  %1257 = vmatpush.bf16.msrb.mxu1 %v2825_v63  ;;  %v2488_v56 = vld [vmem:[#allocation7 + $0x8] sm:$0xf]  ;;  %v3258_v57 = vld [vmem:[#allocation7 + $0x1c] sm:$0xf0]  ;;  %v3255_v58 = vld [vmem:[#allocation7 + $0xc] sm:$0xf]  ;;  %v2709_v59 = vor.u32 %v3309_v48, %v2706_v49  ;;  %v2705_v63 = vor.u32 %v3312_v51, %v2704_v50 }
  0x7c   : > { %v2490_v60 = vld [vmem:[#allocation7 + $0x20] sm:$0xf0]  ;;  %v3303_v61 = vld [vmem:[#allocation7 + $0x18c] sm:$0xf]  ;;  %v2680_v0 = vld [vmem:[#allocation7 + $0x188] sm:$0xf]  ;;  %v2489_v6 = vor.u32 %v3258_v57, %v2488_v56 }
  0x7d   : > { %1245 = vmatpush.bf16.msrb.mxu0 %v2609_v4  ;;  %v2682_v62 = vld [vmem:[#allocation7 + $0x1a0] sm:$0xf0]  ;;  %v2664_v1 = vld [vmem:[#allocation7 + $0x160] sm:$0xf]  ;;  %v3301_v2 = vld [vmem:[#allocation7 + $0x174] sm:$0xf0] }
  0x7e   : > { %1271 = vmatpush.bf16.msrb.mxu2 %v2613_v5  ;;  %v3306_v3 = vld [vmem:[#allocation7 + $0x19c] sm:$0xf0]  ;;  %v3298_v4 = vld [vmem:[#allocation7 + $0x164] sm:$0xf]  ;;  %v2666_v5 = vld [vmem:[#allocation7 + $0x178] sm:$0xf0]  ;;  %v2685_v8 = vor.u32 %v3303_v61, %v2682_v62  ;;  %v2665_v9 = vor.u32 %v3301_v2, %v2664_v1 }
  0x7f   : > { %1284 = vmatpush.bf16.msrb.mxu3 %v2805_v7  ;;  %1258 = vmatpush.bf16.msrb.mxu1 %v2801_v11  ;;  %v2493_v7 = vor.u32 %v3255_v58, %v2490_v60  ;;  %v2681_v10 = vor.u32 %v3306_v3, %v2680_v0  ;;  %v2640_v11 = vld [vmem:[#allocation7 + $0x130] sm:$0xf]  ;;  %v3295_v12 = vld [vmem:[#allocation7 + $0x144] sm:$0xf0]  ;;  %v2669_v13 = vor.u32 %v3298_v4, %v2666_v5  ;;  %v3292_v14 = vld [vmem:[#allocation7 + $0x134] sm:$0xf] }
  0x80   : > { %v2642_v15 = vld [vmem:[#allocation7 + $0x148] sm:$0xf0]  ;;  %v3289_v18 = vld [vmem:[#allocation7 + $0x114] sm:$0xf0]  ;;  %v3286_v20 = vld [vmem:[#allocation7 + $0x104] sm:$0xf] }
  0x81   : > { %1246 = vmatpush.bf16.msrb.mxu0 %v2585_v16  ;;  %v2641_v16 = vor.u32 %v3295_v12, %v2640_v11  ;;  %v2618_v21 = vld [vmem:[#allocation7 + $0x118] sm:$0xf0]  ;;  %v3283_v24 = vld [vmem:[#allocation7 + $0xe4] sm:$0xf0]  ;;  %v3346_v27 = vld [vmem:[#allocation7 + $0x2e4] sm:$0xf] }
  0x82   : > { %1272 = vmatpush.bf16.msrb.mxu2 %v2589_v17  ;;  %v2616_v17 = vld [vmem:[#allocation7 + $0x100] sm:$0xf]  ;;  %v2621_v25 = vor.u32 %v3286_v20, %v2618_v21  ;;  %v3280_v30 = vld [vmem:[#allocation7 + $0xd4] sm:$0xf]  ;;  %v2834_v34 = vld [vmem:[#allocation7 + $0x2c8] sm:$0xf0] }
  0x83   : > { %1285 = vmatpush.bf16.msrb.mxu3 %v2781_v19  ;;  %1259 = vmatpush.bf16.msrb.mxu1 %v2777_v23  ;;  %v2645_v19 = vor.u32 %v3292_v14, %v2642_v15  ;;  %v2617_v22 = vor.u32 %v3289_v18, %v2616_v17  ;;  %v2592_v23 = vld [vmem:[#allocation7 + $0xd0] sm:$0xf]  ;;  %v3340_v33 = vld [vmem:[#allocation7 + $0x2b4] sm:$0xf]  ;;  %v3277_v36 = vld [vmem:[#allocation7 + $0xb4] sm:$0xf0] }
  0x84   : > { %v2593_v26 = vor.u32 %v3283_v24, %v2592_v23  ;;  %v2837_v37 = vor.u32 %v3340_v33, %v2834_v34  ;;  %v3274_v39 = vld [vmem:[#allocation7 + $0xa4] sm:$0xf]  ;;  %v2544_v44 = vld [vmem:[#allocation7 + $0x70] sm:$0xf]  ;;  %v3271_v45 = vld [vmem:[#allocation7 + $0x84] sm:$0xf0] }
  0x85   : > { %1247 = vmatpush.bf16.msrb.mxu0 %v2561_v28  ;;  %v2858_v28 = vld [vmem:[#allocation7 + $0x2f8] sm:$0xf0]  ;;  %v3334_v42 = vld [vmem:[#allocation7 + $0x284] sm:$0xf]  ;;  %v3268_v48 = vld [vmem:[#allocation7 + $0x74] sm:$0xf] }
  0x86   : > { %1273 = vmatpush.bf16.msrb.mxu2 %v2565_v29  ;;  %v2861_v29 = vor.u32 %v3346_v27, %v2858_v28  ;;  %v2546_v49 = vld [vmem:[#allocation7 + $0x88] sm:$0xf0]  ;;  %v2520_v51 = vld [vmem:[#allocation7 + $0x40] sm:$0xf]  ;;  %v2496_v57 = vld [vmem:[#allocation7 + $0x10] sm:$0xf] }
  0x87   : > { %1286 = vmatpush.bf16.msrb.mxu3 %v2757_v31  ;;  %1260 = vmatpush.bf16.msrb.mxu1 %v2753_v35  ;;  %v2594_v31 = vld [vmem:[#allocation7 + $0xe8] sm:$0xf0]  ;;  %v2568_v35 = vld [vmem:[#allocation7 + $0xa0] sm:$0xf]  ;;  %v2549_v50 = vor.u32 %v3268_v48, %v2546_v49  ;;  %v3259_v58 = vld [vmem:[#allocation7 + $0x24] sm:$0xf0] }
  0x88   : > { %v2597_v32 = vor.u32 %v3280_v30, %v2594_v31  ;;  %v2569_v38 = vor.u32 %v3277_v36, %v2568_v35  ;;  %v3262_v61 = vld [vmem:[#allocation7 + $0x44] sm:$0xf]  ;;  %v2522_v62 = vld [vmem:[#allocation7 + $0x58] sm:$0xf0]  ;;  %v3349_v1 = vld [vmem:[#allocation7 + $0x2f4] sm:$0xf0]  ;;  %v2497_v2 = vor.u32 %v3259_v58, %v2496_v57 }
  0x89   : > { %1248 = vmatpush.bf16.msrb.mxu0 %v2537_v40  ;;  %v2570_v40 = vld [vmem:[#allocation7 + $0xb8] sm:$0xf0]  ;;  %v2525_v0 = vor.u32 %v3262_v61, %v2522_v62  ;;  %v3322_v4 = vld [vmem:[#allocation7 + $0x224] sm:$0xf]  ;;  %v3343_v11 = vld [vmem:[#allocation7 + $0x2c4] sm:$0xf0] }
  0x8a   : > { %1274 = vmatpush.bf16.msrb.mxu2 %v2541_v41  ;;  %v2573_v41 = vor.u32 %v3274_v39, %v2570_v40  ;;  %v2762_v5 = vld [vmem:[#allocation7 + $0x238] sm:$0xf0]  ;;  %v2738_v14 = vld [vmem:[#allocation7 + $0x208] sm:$0xf0]  ;;  %v3337_v17 = vld [vmem:[#allocation7 + $0x294] sm:$0xf0] }
  0x8b   : > { %1287 = vmatpush.bf16.msrb.mxu3 %v2733_v43  ;;  %1261 = vmatpush.bf16.msrb.mxu1 %v2729_v47  ;;  %v2810_v43 = vld [vmem:[#allocation7 + $0x298] sm:$0xf0]  ;;  %v2545_v47 = vor.u32 %v3271_v45, %v2544_v44  ;;  %v3331_v23 = vld [vmem:[#allocation7 + $0x264] sm:$0xf0]  ;;  %v2760_v28 = vld [vmem:[#allocation7 + $0x220] sm:$0xf] }
  0x8c   : > { %v2813_v46 = vor.u32 %v3334_v42, %v2810_v43  ;;  %v2714_v20 = vld [vmem:[#allocation7 + $0x1d8] sm:$0xf0]  ;;  %v3319_v33 = vld [vmem:[#allocation7 + $0x204] sm:$0xf0]  ;;  %v2688_v42 = vld [vmem:[#allocation7 + $0x190] sm:$0xf] }
  0x8d   : > { %1249 = vmatpush.bf16.msrb.mxu0 %v2513_v53  ;;  %v3265_v53 = vld [vmem:[#allocation7 + $0x54] sm:$0xf0]  ;;  %v3307_v43 = vld [vmem:[#allocation7 + $0x1a4] sm:$0xf0]  ;;  %s4304_s22 = sld [smem:[#allocation28_spill]]  ;;  %s3446_s26 = sshll.u32 %s4020_s20, 4 }
  0x8e   : > { %1275 = vmatpush.bf16.msrb.mxu2 %v2517_v54  ;;  %v3328_v54 = vld [vmem:[#allocation7 + $0x254] sm:$0xf]  ;;  %v2521_v56 = vor.u32 %v3265_v53, %v2520_v51  ;;  %v2689_v44 = vor.u32 %v3307_v43, %v2688_v42  ;;  %s4305_s6 = sld [smem:[#allocation29_spill]]  ;;  %s595_s20 = scalar_lea.vmem [#allocation16], %s2469_s1 }
  0x8f   : > { %1288 = vmatpush.bf16.msrb.mxu3 %v2709_v59  ;;  %1262 = vmatpush.bf16.msrb.mxu1 %v2705_v63  ;;  %v2786_v59 = vld [vmem:[#allocation7 + $0x268] sm:$0xf0]  ;;  %v2856_v63 = vld [vmem:[#allocation7 + $0x2e0] sm:$0xf]  ;;  %s4306_s25 = sld [smem:[#allocation30_spill]]  ;;  %s2315_s3 = sshll.u32 %s595_s20, 4  ;;  %s2316_s3 = int_to_ptr.vmem [resolvable:$true] %s2315_s3 }
  0x90   : > { %v2789_v60 = vor.u32 %v3328_v54, %v2786_v59  ;;  %v2857_v3 = vor.u32 %v3349_v1, %v2856_v63  ;;  %s2302_s23 = scalar_lea.sflag [#allocation4], %s4123_s19 }
  0x91   : > { %1250 = vmatpush.bf16.msrb.mxu0 %v2489_v6  ;;  %v2765_v6 = vor.u32 %v3322_v4, %v2762_v5 }
  0x92   : > { %1276 = vmatpush.bf16.msrb.mxu2 %v2493_v7  ;;  %v3256_v7 = vld [vmem:[#allocation7 + $0x14] sm:$0xf] }
  0x93   : > { %1289 = vmatpush.bf16.msrb.mxu3 %v2685_v8  ;;  %1263 = vmatpush.bf16.msrb.mxu1 %v2681_v10  ;;  %v2498_v8 = vld [vmem:[#allocation7 + $0x28] sm:$0xf0] }
  0x94   : > { %1251 = vmatmul.bf16.vlgmr.msrb.gmra.mxu0 %v4153_v52  ;;  %v2501_v10 = vor.u32 %v3256_v7, %v2498_v8 }
  0x95   : > { %1295 = vmatpush.bf16.msra.mxu0 %v2665_v9  ;;  %1277 = vmatmul.bf16.vlgmr.msrb.gmra.mxu2 %v4153_v52  ;;  %v2832_v9 = vld [vmem:[#allocation7 + $0x2b0] sm:$0xf]  ;;  %s2313_s24 = scalar_lea.hbm %s4306_s25, %s3446_s26  ;;  %s3845_s1 = scalar_lea.hbm %s4306_s25, 32 }
  0x96   : > { %1321 = vmatpush.bf16.msra.mxu2 %v2669_v13  ;;  %1290 = vmatmul.bf16.vlgmr.msrb.gmra.mxu3 %v4155_v55  ;;  %v2833_v12 = vor.u32 %v3343_v11, %v2832_v9  ;;  %v3316_v13 = vld [vmem:[#allocation7 + $0x1f4] sm:$0xf]  ;;  %s2317_s17 = sshll.u32 %s2313_s24, 4  ;;  %s2318_s17 = int_to_ptr.hbm [resolvable:$true] %s2317_s17 }
  0x97   : > { %1264 = vmatmul.bf16.vlgmr.msrb.gmra.mxu1 %v4155_v55  ;;  %1334 = vmatpush.bf16.msra.mxu3 %v2861_v29  ;;  %v2741_v15 = vor.u32 %v3316_v13, %v2738_v14  ;;  %v3325_v29 = vld [vmem:[#allocation7 + $0x234] sm:$0xf0]  ;;  %s3839_s18 = sshra.s32 %s2318_s17, 4  ;;  %s3840_s18 = int_to_ptr.hbm [resolvable:$true] %s3839_s18 }
  0x98   : > { %1308 = vmatpush.bf16.msra.mxu1 %v2857_v3  ;;  %v2761_v31 = vor.u32 %v3325_v29, %v2760_v28  ;;  %p3846_p12 = scmp.lt.s32.totalorder %s3840_s18, %s4306_s25 }
  0x99   : > { %1296 = vmatpush.bf16.msra.mxu0 %v2641_v16  ;;  %v2808_v16 = vld [vmem:[#allocation7 + $0x280] sm:$0xf] }
  0x9a   : > { %1322 = vmatpush.bf16.msra.mxu2 %v2645_v19  ;;  %v2809_v18 = vor.u32 %v3337_v17, %v2808_v16  ;;  %v3310_v19 = vld [vmem:[#allocation7 + $0x1c4] sm:$0xf] }
  0x9b   : > { %1335 = vmatpush.bf16.msra.mxu3 %v2837_v37  ;;  %v2717_v21 = vor.u32 %v3310_v19, %v2714_v20  ;;  %v2712_v37 = vld [vmem:[#allocation7 + $0x1c0] sm:$0xf] }
  0x9c   : > { %1309 = vmatpush.bf16.msra.mxu1 %v2833_v12 }
  0x9d   : > { %1297 = vmatpush.bf16.msra.mxu0 %v2617_v22  ;;  %v2784_v22 = vld [vmem:[#allocation7 + $0x250] sm:$0xf] }
  0x9e   : > { %1323 = vmatpush.bf16.msra.mxu2 %v2621_v25  ;;  %v2785_v24 = vor.u32 %v3331_v23, %v2784_v22  ;;  %v3304_v25 = vld [vmem:[#allocation7 + $0x194] sm:$0xf] }
  0x9f   : > { %1336 = vmatpush.bf16.msra.mxu3 %v2813_v46 }
  0xa0   : > { %1310 = vmatpush.bf16.msra.mxu1 %v2809_v18 }
  0xa1   : > { %1298 = vmatpush.bf16.msra.mxu0 %v2593_v26  ;;  %v2690_v26 = vld [vmem:[#allocation7 + $0x1a8] sm:$0xf0] }
  0xa2   : > { %1324 = vmatpush.bf16.msra.mxu2 %v2597_v32  ;;  %v2693_v27 = vor.u32 %v3304_v25, %v2690_v26 }
  0xa3   : > { %1337 = vmatpush.bf16.msra.mxu3 %v2789_v60 }
  0xa4   : > { %1311 = vmatpush.bf16.msra.mxu1 %v2785_v24 }
  0xa5   : > { %1299 = vmatpush.bf16.msra.mxu0 %v2569_v38  ;;  %v3313_v38 = vld [vmem:[#allocation7 + $0x1d4] sm:$0xf0] }
  0xa6   : > { %1325 = vmatpush.bf16.msra.mxu2 %v2573_v41  ;;  %v2713_v40 = vor.u32 %v3313_v38, %v2712_v37 }
  0xa7   : > { %1338 = vmatpush.bf16.msra.mxu3 %v2765_v6 }
  0xa8   : > { %1312 = vmatpush.bf16.msra.mxu1 %v2761_v31  ;;  %v1347_v31 = vld [vmem:[#allocation5] sm:$0xff] }
  0xa9   : > { %1300 = vmatpush.bf16.msra.mxu0 %v2545_v47  ;;  %v697_v47 = vld [vmem:[#allocation8] sm:$0x3f] }
  0xaa   : > { %1326 = vmatpush.bf16.msra.mxu2 %v2549_v50  ;;  %v701_v48 = vperm.slane %v697_v47, 2  ;;  %v699_v49 = vperm.slane %v697_v47, 0  ;;  %v700_v59 = vperm.slane %v697_v47, 1  ;;  %v704_v12 = vperm.slane %v697_v47, 5 }
  0xab   : > { %1339 = vmatpush.bf16.msra.mxu3 %v2741_v15  ;;  %v703_v16 = vperm.slane %v697_v47, 4 }
  0xad   : > { %1301 = vmatpush.bf16.msra.mxu0 %v2521_v56  ;;  %v702_v56 = vperm.slane %v697_v47, 3  ;;  %v2986_v47 = vld [vmem:[#allocation10 + $0xf0] sm:$0xf] }
  0xae   : > { %1327 = vmatpush.bf16.msra.mxu2 %v2525_v0 }
  0xaf   : > { %1340 = vmatpush.bf16.msra.mxu3 %v2717_v21 }
  0xb1   : > { %1302 = vmatpush.bf16.msra.mxu0 %v2497_v2 }
  0xb2   : > { %1328 = vmatpush.bf16.msra.mxu2 %v2501_v10 }
  0xb3   : > { %1341 = vmatpush.bf16.msra.mxu3 %v2693_v27 }
  0xb4   : > { %1303 = vmatmul.bf16.vlgmr.msra.gmra.mxu0 %v4153_v52 }
  0xb5   : > { %1329 = vmatmul.bf16.vlgmr.msra.gmra.mxu2 %v4153_v52  ;;  %v2736_v52 = vld [vmem:[#allocation7 + $0x1f0] sm:$0xf] }
  0xb6   : > { %1342 = vmatmul.bf16.vlgmr.msra.gmra.mxu3 %v4155_v55  ;;  %v2737_v34 = vor.u32 %v3319_v33, %v2736_v52 }
  0xb8   : > { %1313 = vmatpush.bf16.msra.mxu1 %v2737_v34 }
  0xbc   : > { %1314 = vmatpush.bf16.msra.mxu1 %v2713_v40 }
  0xc0   : > { %1315 = vmatpush.bf16.msra.mxu1 %v2689_v44 }
  0xc3   : > { %1316 = vmatmul.bf16.vlgmr.msra.gmra.mxu1 %v4155_v55 }
  0xf1   : > { %v1200_v30 = vpop.f32.mrf.mxu0 }
  0xf2   : > { %v1201_v57 = vadd.f32 %v1200_v30, %v699_v49  ;;  %v3380_v49 = vld [vmem:[#allocation10 + $0xf4] sm:$0xf] }
  0xf5   : > { %v1213_v32 = vpop.f32.mrf.mxu1 }
  0xf6   : > { %v1214_v63 = vadd.f32 %v1213_v32, %v1201_v57 }
  0xf8   : > { %v1226_v35 = vpop.f32.mrf.mxu2  ;;  %v1348_v4 = vpack.c.bf16 %v1214_v63, %v1214_v63  ;;  %v3378_v63 = vld [vmem:[#allocation10 + $0xe4] sm:$0xf] }
  0xf9   : > { %v1239_v36 = vpop.f32.mrf.mxu3  ;;  %v1202_v39 = vpop.f32.mrf.mxu0  ;;  %v1227_v2 = vadd.f32 %v1226_v35, %v700_v59  ;;  %v2924_v59 = vld [vmem:[#allocation10 + $0x78] sm:$0xf0] }
  0xfb   : > { %v1240_v5 = vadd.f32 %v1239_v36, %v1227_v2 }
  0xfd   : > { %v1215_v41 = vpop.f32.mrf.mxu1  ;;  %v1399_v8 = vpack.c.bf16 %v1240_v5, %v1240_v5 }
 0x100   : > { %v1228_v45 = vpop.f32.mrf.mxu2 }
 0x101   : > { %v1241_v46 = vpop.f32.mrf.mxu3 }
 0x111   : > { %v1252_v50 = vpop.f32.mrf.mxu0 }
 0x112   : > { %v1253_v51 = vadd.f32 %v1252_v50, %v701_v48  ;;  %v3381_v48 = vld [vmem:[#allocation10 + $0xf4] sm:$0xf0] }
 0x113   : > { %v2987_v50 = vor.u32 %v3381_v48, %v2986_v47  ;;  %v3370_v48 = vld [vmem:[#allocation10 + $0xa4] sm:$0xf] }
 0x114   : > { %v1265_v53 = vpop.f32.mrf.mxu1 }
 0x115   : > { %v1266_v54 = vadd.f32 %v1265_v53, %v1253_v51  ;;  %v2988_v51 = vld [vmem:[#allocation10 + $0xf8] sm:$0xf0]  ;;  %v2922_v53 = vld [vmem:[#allocation10 + $0x70] sm:$0xf] }
 0x117   : > { %v1349_v58 = vpack.c.bf16 %v1266_v54, %v1266_v54  ;;  %v3365_v54 = vld [vmem:[#allocation10 + $0x74] sm:$0xf0] }
 0x118   : > { %v1278_v60 = vpop.f32.mrf.mxu2  ;;  %v2923_v57 = vor.u32 %v3365_v54, %v2922_v53  ;;  %v3354_v53 = vld [vmem:[#allocation10 + $0x24] sm:$0xf]  ;;  %v2884_v54 = vld [vmem:[#allocation10 + $0x28] sm:$0xf0] }
 0x119   : > { %v1279_v61 = vadd.f32 %v1278_v60, %v702_v56  ;;  %v1291_v62 = vpop.f32.mrf.mxu3  ;;  %1358 = vmatpush.bf16.xpose.msrb.mxu0 %v1349_v58  ;;  %v1254_v0 = vpop.f32.mrf.mxu0  ;;  %v2991_v56 = vor.u32 %v3380_v49, %v2988_v51  ;;  %v3364_v58 = vld [vmem:[#allocation10 + $0x74] sm:$0xf]  ;;  %v2978_v60 = vld [vmem:[#allocation10 + $0xe0] sm:$0xf]  ;;  %v2948_v51 = vld [vmem:[#allocation10 + $0xa8] sm:$0xf0] }
 0x11a   : > { %v2980_v0 = vld [vmem:[#allocation10 + $0xe8] sm:$0xf0]  ;;  %v2882_v49 = vld [vmem:[#allocation10 + $0x20] sm:$0xf] }
 0x11b   : > { %v1292_v1 = vadd.f32 %v1291_v62, %v1279_v61  ;;  %v2927_v61 = vor.u32 %v3364_v58, %v2924_v59  ;;  %v3379_v62 = vld [vmem:[#allocation10 + $0xe4] sm:$0xf0]  ;;  %v2983_v2 = vor.u32 %v3378_v63, %v2980_v0  ;;  %v2951_v63 = vor.u32 %v3370_v48, %v2948_v51 }
 0x11c   : > { %v1267_v55 = vpop.f32.mrf.mxu1  ;;  %v2887_v0 = vor.u32 %v3354_v53, %v2884_v54  ;;  %v3920_v51 = vmov 256.0   ;;  %v3050_v53 = vld [vmem:[#allocation11 + $0x70] sm:$0xf]  ;;  %v3397_v54 = vld [vmem:[#allocation11 + $0x74] sm:$0xf0] }
 0x11d   : > { %v1400_v3 = vpack.c.bf16 %v1292_v1, %v1292_v1  ;;  %v2979_v1 = vor.u32 %v3379_v62, %v2978_v60  ;;  %v2914_v55 = vld [vmem:[#allocation10 + $0x60] sm:$0xf]  ;;  %v3369_v62 = vld [vmem:[#allocation10 + $0x94] sm:$0xf0] }
 0x11f   : > { %1409 = vmatpush.bf16.xpose.msrb.mxu2 %v1400_v3  ;;  %v3363_v3 = vld [vmem:[#allocation10 + $0x64] sm:$0xf0] }
 0x120   : > { %v1280_v6 = vpop.f32.mrf.mxu2  ;;  %1359 = vmatmul.bf16.vlgmr.msrb.gmra.mxu0 %v1348_v4  ;;  %v3362_v4 = vld [vmem:[#allocation10 + $0x64] sm:$0xf]  ;;  %v2915_v5 = vor.u32 %v3363_v3, %v2914_v55  ;;  %v3353_v55 = vld [vmem:[#allocation10 + $0x14] sm:$0xf0] }
 0x121   : > { %v1293_v7 = vpop.f32.mrf.mxu3  ;;  %1648 = vmatpush.bf16.msra.mxu0 %v2923_v57  ;;  %v2916_v6 = vld [vmem:[#allocation10 + $0x68] sm:$0xf0] }
 0x122   : > { %v2970_v7 = vld [vmem:[#allocation10 + $0xd0] sm:$0xf] }
 0x125   : > { %1649 = vmatpush.bf16.msra.mxu0 %v2915_v5  ;;  %v3352_v5 = vld [vmem:[#allocation10 + $0x14] sm:$0xf] }
 0x126   : > { %1410 = vmatmul.bf16.vlgmr.msrb.gmra.mxu2 %v1399_v8  ;;  %v3377_v8 = vld [vmem:[#allocation10 + $0xd4] sm:$0xf0] }
 0x127   : > { %1674 = vmatpush.bf16.msra.mxu2 %v2927_v61  ;;  %v2938_v61 = vld [vmem:[#allocation10 + $0x90] sm:$0xf] }
 0x131   : > { %v1304_v9 = vpop.f32.mrf.mxu0 }
 0x132   : > { %v1305_v19 = vadd.f32 %v1304_v9, %v703_v16  ;;  %v2919_v9 = vor.u32 %v3362_v4, %v2916_v6  ;;  %v2908_v16 = vld [vmem:[#allocation10 + $0x58] sm:$0xf0] }
 0x133   : > { %v2940_v4 = vld [vmem:[#allocation10 + $0x98] sm:$0xf0] }
 0x134   : > { %1675 = vmatpush.bf16.msra.mxu2 %v2919_v9  ;;  %v2876_v6 = vld [vmem:[#allocation10 + $0x18] sm:$0xf0] }
 0x135   : > { %v2879_v9 = vor.u32 %v3352_v5, %v2876_v6 }
 0x138   : > { %v1330_v10 = vpop.f32.mrf.mxu2 }
 0x139   : > { %v1306_v11 = vpop.f32.mrf.mxu0  ;;  %v1331_v13 = vadd.f32 %v1330_v10, %v704_v12  ;;  %v1343_v15 = vpop.f32.mrf.mxu3  ;;  %v3376_v10 = vld [vmem:[#allocation10 + $0xd4] sm:$0xf]  ;;  %v2906_v12 = vld [vmem:[#allocation10 + $0x50] sm:$0xf] }
 0x13a   : > { %v2972_v11 = vld [vmem:[#allocation10 + $0xd8] sm:$0xf0] }
 0x13b   : > { %v1344_v17 = vadd.f32 %v1343_v15, %v1331_v13  ;;  %v2971_v13 = vor.u32 %v3377_v8, %v2970_v7  ;;  %v3360_v15 = vld [vmem:[#allocation10 + $0x54] sm:$0xf]  ;;  %v2939_v7 = vor.u32 %v3369_v62, %v2938_v61 }
 0x13d   : > { %v1401_v18 = vpack.c.bf16 %v1344_v17, %v1344_v17  ;;  %v2975_v17 = vor.u32 %v3376_v10, %v2972_v11 }
 0x13f   : > { %v1433_v20 = vsel %vm1382_vm0, %v1401_v18, 0 }
 0x140   : > { %v1332_v14 = vpop.f32.mrf.mxu2  ;;  %1442 = vmatpush.bf16.msrb.mxu3 %v1433_v20  ;;  %v1317_v21 = vpop.f32.mrf.mxu1  ;;  %v3375_v20 = vld [vmem:[#allocation10 + $0xc4] sm:$0xf0] }
 0x141   : > { %v1345_v22 = vpop.f32.mrf.mxu3  ;;  %v1318_v23 = vadd.f32 %v1317_v21, %v1305_v19  ;;  %v3361_v14 = vld [vmem:[#allocation10 + $0x54] sm:$0xf0]  ;;  %v2962_v19 = vld [vmem:[#allocation10 + $0xc0] sm:$0xf]  ;;  %v3374_v21 = vld [vmem:[#allocation10 + $0xc4] sm:$0xf] }
 0x142   : > { %v2907_v18 = vor.u32 %v3361_v14, %v2906_v12  ;;  %v2911_v22 = vor.u32 %v3360_v15, %v2908_v16  ;;  %v3367_v14 = vld [vmem:[#allocation10 + $0x84] sm:$0xf0]  ;;  %v3366_v15 = vld [vmem:[#allocation10 + $0x84] sm:$0xf] }
 0x143   : > { %v1350_v24 = vpack.c.bf16 %v1318_v23, %v1318_v23  ;;  %v2964_v23 = vld [vmem:[#allocation10 + $0xc8] sm:$0xf0] }
 0x144   : > { %1687 = vmatpush.bf16.msra.mxu3 %v2991_v56  ;;  %1650 = vmatpush.bf16.msra.mxu0 %v2907_v18 }
 0x145   : > { %v1384_v25 = vsel %vm1382_vm0, %v1350_v24, 0  ;;  %v2898_v24 = vld [vmem:[#allocation10 + $0x40] sm:$0xf]  ;;  %1676 = vmatpush.bf16.msra.mxu2 %v2911_v22 }
 0x146   : > { %1393 = vmatpush.bf16.msrb.mxu1 %v1384_v25  ;;  %v3359_v25 = vld [vmem:[#allocation10 + $0x44] sm:$0xf0] }
 0x148   : > { %v1319_v26 = vpop.f32.mrf.mxu1  ;;  %1688 = vmatpush.bf16.msra.mxu3 %v2983_v2  ;;  %v2874_v2 = vld [vmem:[#allocation10 + $0x10] sm:$0xf] }
 0x149   : > { %v3358_v26 = vld [vmem:[#allocation10 + $0x44] sm:$0xf] }
 0x14a   : > { %1661 = vmatpush.bf16.msra.mxu1 %v2987_v50  ;;  %v3355_v50 = vld [vmem:[#allocation10 + $0x24] sm:$0xf0] }
 0x14b   : > { %v2883_v60 = vor.u32 %v3355_v50, %v2882_v49 }
 0x14c   : > { %1689 = vmatpush.bf16.msra.mxu3 %v2975_v17  ;;  %v2932_v17 = vld [vmem:[#allocation10 + $0x88] sm:$0xf0] }
 0x14d   : > { %v2935_v18 = vor.u32 %v3366_v15, %v2932_v17  ;;  %v3106_v15 = vld [vmem:[#allocation11 + $0xe0] sm:$0xf]  ;;  %v3411_v17 = vld [vmem:[#allocation11 + $0xe4] sm:$0xf0] }
 0x14e   : > { %1662 = vmatpush.bf16.msra.mxu1 %v2979_v1  ;;  %v3368_v1 = vld [vmem:[#allocation10 + $0x94] sm:$0xf] }
 0x14f   : > { %v2943_v8 = vor.u32 %v3368_v1, %v2940_v4  ;;  %v3116_v1 = vld [vmem:[#allocation11 + $0xf8] sm:$0xf0] }
 0x152   : > { %1663 = vmatpush.bf16.msra.mxu1 %v2971_v13  ;;  %v2930_v13 = vld [vmem:[#allocation10 + $0x80] sm:$0xf] }
 0x153   : > { %v2931_v16 = vor.u32 %v3367_v14, %v2930_v13  ;;  %v3042_v13 = vld [vmem:[#allocation11 + $0x60] sm:$0xf]  ;;  %v3395_v14 = vld [vmem:[#allocation11 + $0x64] sm:$0xf0] }
 0x19d   : > { %v1360_v27 = vpop.f32.mrf.mxu0 }
 0x19e   : > { %v1364_v52 = vmul.f32 0.088388346, %v1360_v27  ;;  %v2900_v27 = vld [vmem:[#allocation10 + $0x48] sm:$0xf0] }
 0x1a0   : > { %v1365_v35 = vadd.f32 %v1364_v52, %v1347_v31  ;;  %v3373_v52 = vld [vmem:[#allocation10 + $0xb4] sm:$0xf0] }
 0x1a2   : > { %v1367_v36 = vsel %vm1366_vm1, %v1365_v35, -inf }
 0x1a5   : > { %v1362_v28 = vpop.f32.mrf.mxu0 }
 0x1a6   : > { %v2963_v28 = vor.u32 %v3375_v20, %v2962_v19  ;;  %v2866_v19 = vld [vmem:[#allocation10] sm:$0xf]  ;;  %v3351_v20 = vld [vmem:[#allocation10 + $0x4] sm:$0xf0] }
 0x1a7   : > { %v2867_v22 = vor.u32 %v3351_v20, %v2866_v19  ;;  %v3044_v19 = vld [vmem:[#allocation11 + $0x68] sm:$0xf0]  ;;  %v3107_v20 = vor.u32 %v3411_v17, %v3106_v15  ;;  %v3384_v17 = vld [vmem:[#allocation11 + $0x14] sm:$0xf] }
 0x1a8   : > { %1664 = vmatpush.bf16.msra.mxu1 %v2963_v28 }
 0x1a9   : > { %v1411_v29 = vpop.f32.mrf.mxu2 }
 0x1aa   : > { %v1415_v30 = vmul.f32 0.088388346, %v1411_v29 }
 0x1ac   : > { %v1416_v32 = vadd.f32 %v1415_v30, %v1347_v31  ;;  %v2967_v30 = vor.u32 %v3374_v21, %v2964_v23  ;;  %v2899_v31 = vor.u32 %v3359_v25, %v2898_v24  ;;  %v3350_v21 = vld [vmem:[#allocation10 + $0x4] sm:$0xf]  ;;  %v2868_v23 = vld [vmem:[#allocation10 + $0x8] sm:$0xf0] }
 0x1ae   : > { %v1417_v33 = vsel %vm1366_vm1, %v1416_v32, -inf  ;;  %1690 = vmatpush.bf16.msra.mxu3 %v2967_v30  ;;  %1651 = vmatpush.bf16.msra.mxu0 %v2899_v31  ;;  %v1482_v30 = vld [vmem:[%s4274_s5] sm:$0x3] }
 0x1af   : > { %1418 = vmax.xlane.f32.xlu0 %v1417_v33  ;;  %v3372_v33 = vld [vmem:[#allocation10 + $0xb4] sm:$0xf] }
 0x1b1   : > { %v1413_v34 = vpop.f32.mrf.mxu2 }
 0x1b2   : > { %v2903_v34 = vor.u32 %v3358_v26, %v2900_v27 }
 0x1b4   : > { %1677 = vmatpush.bf16.msra.mxu2 %v2903_v34  ;;  %v1485_v34 = vperm.slane %v1482_v30, 1 }
 0x1b7   : > { %1368 = vmax.xlane.f32.xlu0 %v1367_v36  ;;  %v2890_v36 = vld [vmem:[#allocation10 + $0x30] sm:$0xf] }
 0x222   : > { %v1419_v37 = vpop.xlane.xlu0 %1418 }
 0x223   : > { %v1420_v38 = vsub.f32 %v1416_v32, %v1419_v37  ;;  %v2954_v32 = vld [vmem:[#allocation10 + $0xb0] sm:$0xf]  ;;  %v3357_v37 = vld [vmem:[#allocation10 + $0x34] sm:$0xf0] }
 0x225   : > { %v1421_v39 = vmul.f32 1.442695, %v1420_v38  ;;  %v3356_v38 = vld [vmem:[#allocation10 + $0x34] sm:$0xf] }
 0x227   : > { %3569 = vpow2.f32 %v1421_v39  ;;  %v2892_v39 = vld [vmem:[#allocation10 + $0x38] sm:$0xf0] }
 0x228   : > { %v2895_v47 = vor.u32 %v3356_v38, %v2892_v39 }
 0x22a   : > { %v1369_v40 = vpop.xlane.xlu0 %1368  ;;  %1678 = vmatpush.bf16.msra.mxu2 %v2895_v47 }
 0x22b   : > { %v1370_v41 = vsub.f32 %v1365_v35, %v1369_v40  ;;  %v2956_v35 = vld [vmem:[#allocation10 + $0xb8] sm:$0xf0]  ;;  %v2955_v40 = vor.u32 %v3373_v52, %v2954_v32  ;;  %v1484_v32 = vperm.slane %v1482_v30, 0 }
 0x22c   : > { %v3036_v30 = vld [vmem:[#allocation11 + $0x58] sm:$0xf0] }
 0x22d   : > { %v4171_v42 = vpop.eup %3569  ;;  %v1371_v43 = vmul.f32 1.442695, %v1370_v41  ;;  %v2959_v41 = vor.u32 %v3372_v33, %v2956_v35  ;;  %1665 = vmatpush.bf16.msra.mxu1 %v2955_v40 }
 0x22e   : > { %v1423_v44 = vsel %vm1366_vm1, %v4171_v42, 0.0  ;;  %1679 = vmatpush.bf16.msra.mxu2 %v2887_v0  ;;  %v3412_v0 = vld [vmem:[#allocation11 + $0xf4] sm:$0xf] }
 0x22f   : > { %3571 = vpow2.f32 %v1371_v43  ;;  %1424 = vadd.xlane.f32.xlu1 %v1423_v44  ;;  %v2891_v43 = vor.u32 %v3357_v37, %v2890_v36  ;;  %v2946_v44 = vld [vmem:[#allocation10 + $0xa0] sm:$0xf]  ;;  %1691 = vmatpush.bf16.msra.mxu3 %v2959_v41 }
 0x231   : > { %1652 = vmatpush.bf16.msra.mxu0 %v2891_v43  ;;  %v3583_v43 = vld [vmem:[%s4129_s4] sm:$0xff] }
 0x232   : > { %1680 = vmatpush.bf16.msra.mxu2 %v2879_v9 }
 0x233   : > { %1692 = vmatpush.bf16.msra.mxu3 %v2951_v63 }
 0x235   : > { %v4175_v45 = vpop.eup %3571  ;;  %1653 = vmatpush.bf16.msra.mxu0 %v2883_v60  ;;  %v3052_v60 = vld [vmem:[#allocation11 + $0x78] sm:$0xf0] }
 0x236   : > { %v1373_v46 = vsel %vm1366_vm1, %v4175_v45, 0.0 }
 0x237   : > { %1374 = vadd.xlane.f32.xlu1 %v1373_v46  ;;  %v3371_v46 = vld [vmem:[#allocation10 + $0xa4] sm:$0xf0]  ;;  %1693 = vmatpush.bf16.msra.mxu3 %v2943_v8 }
 0x238   : > { %v2947_v57 = vor.u32 %v3371_v46, %v2946_v44  ;;  %v3584_v46 = vld [vmem:[%s4129_s4 + $0x8] sm:$0xff] }
 0x23a   : > { %1666 = vmatpush.bf16.msra.mxu1 %v2947_v57  ;;  %v3051_v57 = vor.u32 %v3397_v54, %v3050_v53  ;;  %v3405_v54 = vld [vmem:[#allocation11 + $0xb4] sm:$0xf0] }
 0x23b   : > { %1694 = vmatpush.bf16.msra.mxu3 %v2935_v18  ;;  %v3394_v18 = vld [vmem:[#allocation11 + $0x64] sm:$0xf] }
 0x23e   : > { %1667 = vmatpush.bf16.msra.mxu1 %v2939_v7 }
 0x242   : > { %1668 = vmatpush.bf16.msra.mxu1 %v2931_v16  ;;  %v3043_v16 = vor.u32 %v3395_v14, %v3042_v13  ;;  %v3385_v13 = vld [vmem:[#allocation11 + $0x14] sm:$0xf0]  ;;  %v3066_v14 = vld [vmem:[#allocation11 + $0x90] sm:$0xf] }
 0x2a2   : > { %v1425_v29 = vpop.xlane.xlu1 %1424 }
 0x2a3   : > { %3573 = vrcp.f32 %v1425_v29 }
 0x2a9   : > { %v3574_v56 = vpop.eup %3573 }
 0x2aa   : > { %v1427_v58 = vmul.f32 %v3574_v56, %v4171_v42  ;;  %v1375_v59 = vpop.xlane.xlu1 %1374  ;;  %v2875_v42 = vor.u32 %v3353_v55, %v2874_v2  ;;  %v3114_v56 = vld [vmem:[#allocation11 + $0xf0] sm:$0xf]  ;;  %v3119_v2 = vor.u32 %v3412_v0, %v3116_v1  ;;  %v3387_v0 = vld [vmem:[#allocation11 + $0x24] sm:$0xf0]  ;;  %v3074_v1 = vld [vmem:[#allocation11 + $0xa0] sm:$0xf] }
 0x2ab   : > { %3575 = vrcp.f32 %v1375_v59  ;;  %v3396_v59 = vld [vmem:[#allocation11 + $0x74] sm:$0xf] }
 0x2ac   : > { %v1428_v3 = vpack.c.bf16 %v1427_v58, %v1427_v58  ;;  %1654 = vmatpush.bf16.msra.mxu0 %v2875_v42  ;;  %3577 = vrcp.f32 %v3920_v51  ;;  %v3413_v58 = vld [vmem:[#allocation11 + $0xf4] sm:$0xf0]  ;;  %v3055_v63 = vor.u32 %v3396_v59, %v3052_v60  ;;  %v3082_v51 = vld [vmem:[#allocation11 + $0xb0] sm:$0xf]  ;;  %v3404_v60 = vld [vmem:[#allocation11 + $0xb4] sm:$0xf] }
 0x2ad   : > { %v3115_v62 = vor.u32 %v3413_v58, %v3114_v56  ;;  %v3388_v56 = vld [vmem:[#allocation11 + $0x34] sm:$0xf]  ;;  %v3083_v58 = vor.u32 %v3405_v54, %v3082_v51  ;;  %v3445_v51 = vld [vmem:[#allocation13 + $0xf4] sm:$0xf0] }
 0x2ae   : > { %2863 = vmatmul.msk.bf16.vlgmr.msrb.gmra.mxu3 %vm1366_vm1, %v1428_v3 }
 0x2af   : > { %1989 = vmatpush.bf16.msrb.mxu3 %v3119_v2 }
 0x2b0   : > { %1655 = vmatpush.bf16.msra.mxu0 %v2867_v22  ;;  %v3410_v22 = vld [vmem:[#allocation11 + $0xe4] sm:$0xf] }
 0x2b1   : > { %v3576_v10 = vpop.eup %3575 }
 0x2b2   : > { %v1377_v11 = vmul.f32 %v3576_v10, %v4175_v45  ;;  %v2871_v45 = vor.u32 %v3350_v21, %v2868_v23  ;;  %v3578_v61 = vpop.eup %3577  ;;  %v3047_v21 = vor.u32 %v3394_v18, %v3044_v19  ;;  %v3108_v23 = vld [vmem:[#allocation11 + $0xe8] sm:$0xf0]  ;;  %v3004_v18 = vld [vmem:[#allocation11 + $0x18] sm:$0xf0] }
 0x2b3   : > { %v1708_v55 = vmul.f32 256.0, %v3578_v61  ;;  %vm1712_vm2 = vweird.f32 %v3578_v61 }
 0x2b4   : > { %v1378_v12 = vpack.c.bf16 %v1377_v11, %v1377_v11  ;;  %1681 = vmatpush.bf16.msra.mxu2 %v2871_v45  ;;  %1950 = vmatpush.bf16.msrb.mxu0 %v3051_v57  ;;  %v3111_v45 = vor.u32 %v3410_v22, %v3108_v23  ;;  %v3020_v57 = vld [vmem:[#allocation11 + $0x38] sm:$0xf0]  ;;  %v2994_v23 = vld [vmem:[#allocation11] sm:$0xf] }
 0x2b5   : > { %v1709_v3 = vsub.f32 1.0, %v1708_v55  ;;  %v3023_v59 = vor.u32 %v3388_v56, %v3020_v57  ;;  %v3403_v55 = vld [vmem:[#allocation11 + $0xa4] sm:$0xf0]  ;;  %v3068_v22 = vld [vmem:[#allocation11 + $0x98] sm:$0xf0] }
 0x2b6   : > { %2862 = vmatmul.msk.bf16.vlgmr.msrb.gmra.mxu1 %vm1366_vm1, %v1378_v12  ;;  %1990 = vmatpush.bf16.msrb.mxu3 %v3111_v45  ;;  %v3244_v57 = vld [vmem:[#allocation13 + $0xf8] sm:$0xf0] }
 0x2b7   : > { %1963 = vmatpush.bf16.msrb.mxu1 %v3115_v62  ;;  %v1710_v4 = vmul.f32 %v3578_v61, %v1709_v3  ;;  %v3386_v3 = vld [vmem:[#allocation11 + $0x24] sm:$0xf] }
 0x2b8   : > { %1976 = vmatpush.bf16.msrb.mxu2 %v3055_v63  ;;  %1951 = vmatpush.bf16.msrb.mxu0 %v3043_v16  ;;  %v3010_v63 = vld [vmem:[#allocation11 + $0x20] sm:$0xf]  ;;  %v3401_v16 = vld [vmem:[#allocation11 + $0x94] sm:$0xf0] }
 0x2b9   : > { %v1711_v5 = vadd.f32 %v3578_v61, %v1710_v4  ;;  %v3011_v2 = vor.u32 %v3387_v0, %v3010_v63  ;;  %v3012_v4 = vld [vmem:[#allocation11 + $0x28] sm:$0xf0]  ;;  %v3067_v19 = vor.u32 %v3401_v16, %v3066_v14  ;;  %v3234_v63 = vld [vmem:[#allocation13 + $0xe0] sm:$0xf]  ;;  %v3443_v0 = vld [vmem:[#allocation13 + $0xe4] sm:$0xf0] }
 0x2ba   : > { %v3440_v14 = vld [vmem:[#allocation13 + $0xd4] sm:$0xf] }
 0x2bb   : > { %v4188_v6 = vsel %vm1712_vm2, %v3578_v61, %v1711_v5  ;;  %1964 = vmatpush.bf16.msrb.mxu1 %v3107_v20  ;;  %v3084_v61 = vld [vmem:[#allocation11 + $0xb8] sm:$0xf0]  ;;  %v3075_v5 = vor.u32 %v3403_v55, %v3074_v1  ;;  %v3007_v20 = vor.u32 %v3384_v17, %v3004_v18  ;;  %v3442_v1 = vld [vmem:[#allocation13 + $0xe4] sm:$0xf] }
 0x2bc   : > { %1977 = vmatpush.bf16.msrb.mxu2 %v3047_v21  ;;  %v3087_v62 = vor.u32 %v3404_v60, %v3084_v61  ;;  %v3400_v21 = vld [vmem:[#allocation11 + $0x94] sm:$0xf] }
 0x2bd   : > { %v3071_v45 = vor.u32 %v3400_v21, %v3068_v22  ;;  %v3424_v61 = vld [vmem:[#allocation13 + $0x54] sm:$0xf]  ;;  %v3218_v21 = vld [vmem:[#allocation13 + $0xc0] sm:$0xf]  ;;  %v3439_v22 = vld [vmem:[#allocation13 + $0xc4] sm:$0xf0] }
 0x331   : > { %v1444_v24 = vpop.f32.mrf.mxu3 }
 0x332   : > { %v1449_v25 = vpack.c.bf16 %v1444_v24, %v1444_v24  ;;  %v3034_v24 = vld [vmem:[#allocation11 + $0x50] sm:$0xf] }
 0x333   : > { %v1395_v26 = vpop.f32.mrf.mxu1 }
 0x334   : > { %v1448_v27 = vpack.c.bf16 %v1395_v26, %v1395_v26  ;;  %1669 = vmatmul.bf16.vlgmr.msra.gmra.mxu1 %v1449_v25  ;;  %1695 = vmatmul.bf16.vlgmr.msra.gmra.mxu3 %v1449_v25  ;;  %v3393_v25 = vld [vmem:[#allocation11 + $0x54] sm:$0xf0]  ;;  %v3098_v26 = vld [vmem:[#allocation11 + $0xd0] sm:$0xf] }
 0x336   : > { %1656 = vmatmul.bf16.vlgmr.msra.gmra.mxu0 %v1448_v27  ;;  %1682 = vmatmul.bf16.vlgmr.msra.gmra.mxu2 %v1448_v27  ;;  %v3035_v27 = vor.u32 %v3393_v25, %v3034_v24  ;;  %v3383_v24 = vld [vmem:[#allocation11 + $0x4] sm:$0xf0]  ;;  %v3058_v25 = vld [vmem:[#allocation11 + $0x80] sm:$0xf] }
 0x338   : > { %1952 = vmatpush.bf16.msrb.mxu0 %v3035_v27  ;;  %v2995_v27 = vor.u32 %v3383_v24, %v2994_v23  ;;  %v3421_v24 = vld [vmem:[#allocation13 + $0x34] sm:$0xf0] }
 0x339   : > { %v1446_v28 = vpop.f32.mrf.mxu3 }
 0x33a   : > { %v3409_v28 = vld [vmem:[#allocation11 + $0xd4] sm:$0xf0] }
 0x33b   : > { %v1397_v29 = vpop.f32.mrf.mxu1 }
 0x33c   : > { %v3392_v29 = vld [vmem:[#allocation11 + $0x54] sm:$0xf] }
 0x3b1   : > { %v1670_v31 = vpop.f32.mrf.mxu1 }
 0x3b3   : > { %v1657_v52 = vpop.f32.mrf.mxu0 }
 0x3b4   : > { %v1658_v33 = vadd.f32 %v1657_v52, %v1484_v32  ;;  %v3039_v32 = vor.u32 %v3392_v29, %v3036_v30  ;;  %v3408_v52 = vld [vmem:[#allocation11 + $0xd4] sm:$0xf]  ;;  %v3382_v29 = vld [vmem:[#allocation11 + $0x4] sm:$0xf]  ;;  %v2996_v30 = vld [vmem:[#allocation11 + $0x8] sm:$0xf0] }
 0x3b6   : > { %v1671_v38 = vadd.f32 %v1670_v31, %v1658_v33  ;;  %v3099_v31 = vor.u32 %v3409_v28, %v3098_v26  ;;  %v3100_v33 = vld [vmem:[#allocation11 + $0xd8] sm:$0xf0]  ;;  %1978 = vmatpush.bf16.msrb.mxu2 %v3039_v32  ;;  %v3399_v26 = vld [vmem:[#allocation11 + $0x84] sm:$0xf0]  ;;  %v2999_v32 = vor.u32 %v3382_v29, %v2996_v30  ;;  %v3219_v30 = vor.u32 %v3439_v22, %v3218_v21  ;;  %v3433_v21 = vld [vmem:[#allocation13 + $0x94] sm:$0xf0] }
 0x3b7   : > { %v1696_v35 = vpop.f32.mrf.mxu3  ;;  %v3059_v28 = vor.u32 %v3399_v26, %v3058_v25  ;;  %v3438_v25 = vld [vmem:[#allocation13 + $0xc4] sm:$0xf]  ;;  %v3220_v26 = vld [vmem:[#allocation13 + $0xc8] sm:$0xf0] }
 0x3b8   : > { %v1700_v44 = vadd.f32 %v3583_v43, %v1671_v38  ;;  %1965 = vmatpush.bf16.msrb.mxu1 %v3099_v31  ;;  %v3398_v31 = vld [vmem:[#allocation11 + $0x84] sm:$0xf] }
 0x3b9   : > { %v1672_v36 = vpop.f32.mrf.mxu1  ;;  %v1683_v37 = vpop.f32.mrf.mxu2 }
 0x3ba   : > { %v1684_v39 = vadd.f32 %v1683_v37, %v1485_v34  ;;  %v3103_v34 = vor.u32 %v3408_v52, %v3100_v33  ;;  %v3391_v36 = vld [vmem:[#allocation11 + $0x44] sm:$0xf0]  ;;  %v3090_v37 = vld [vmem:[#allocation11 + $0xc0] sm:$0xf]  ;;  %v3060_v52 = vld [vmem:[#allocation11 + $0x88] sm:$0xf0] }
 0x3bb   : > { %v1659_v40 = vpop.f32.mrf.mxu0  ;;  %v3063_v33 = vor.u32 %v3398_v31, %v3060_v52 }
 0x3bc   : > { %v1697_v41 = vadd.f32 %v1696_v35, %v1684_v39  ;;  %v3026_v35 = vld [vmem:[#allocation11 + $0x40] sm:$0xf]  ;;  %1991 = vmatpush.bf16.msrb.mxu3 %v3103_v34  ;;  %v3407_v39 = vld [vmem:[#allocation11 + $0xc4] sm:$0xf0]  ;;  %v3390_v40 = vld [vmem:[#allocation11 + $0x44] sm:$0xf] }
 0x3bd   : > { %v3027_v38 = vor.u32 %v3391_v36, %v3026_v35  ;;  %v3091_v43 = vor.u32 %v3407_v39, %v3090_v37  ;;  %v3178_v35 = vld [vmem:[#allocation13 + $0x70] sm:$0xf]  ;;  %v3429_v36 = vld [vmem:[#allocation13 + $0x74] sm:$0xf0]  ;;  %v3428_v37 = vld [vmem:[#allocation13 + $0x74] sm:$0xf] }
 0x3be   : > { %v1701_v47 = vadd.f32 %v3584_v46, %v1697_v41  ;;  %v3028_v41 = vld [vmem:[#allocation11 + $0x48] sm:$0xf0]  ;;  %v3406_v46 = vld [vmem:[#allocation11 + $0xc4] sm:$0xf]  ;;  %v3179_v39 = vor.u32 %v3429_v36, %v3178_v35  ;;  %v3419_v35 = vld [vmem:[#allocation13 + $0x24] sm:$0xf0] }
 0x3bf   : > { %v1698_v48 = vpop.f32.mrf.mxu3  ;;  %1953 = vmatpush.bf16.msrb.mxu0 %v3027_v38  ;;  %1966 = vmatpush.bf16.msrb.mxu1 %v3091_v43  ;;  %v3427_v43 = vld [vmem:[#allocation13 + $0x64] sm:$0xf0]  ;;  %v3418_v36 = vld [vmem:[#allocation13 + $0x24] sm:$0xf] }
 0x3c0   : > { %v1704_v49 = vadd.f32 %v1701_v47, %v1700_v44 }
 0x3c1   : > { %v1685_v50 = vpop.f32.mrf.mxu2 }
 0x3c2   : > { %1705 = vadd.xlane.f32.xlu2 %v1704_v49  ;;  %v3018_v49 = vld [vmem:[#allocation11 + $0x30] sm:$0xf]  ;;  %v3389_v50 = vld [vmem:[#allocation11 + $0x34] sm:$0xf0] }
 0x3c3   : > { %v3019_v53 = vor.u32 %v3389_v50, %v3018_v49  ;;  %1967 = vmatpush.bf16.msrb.mxu1 %v3083_v58  ;;  %v3162_v58 = vld [vmem:[#allocation13 + $0x50] sm:$0xf] }
 0x3c5   : > { %1954 = vmatpush.bf16.msrb.mxu0 %v3019_v53  ;;  %v3444_v53 = vld [vmem:[#allocation13 + $0xf4] sm:$0xf] }
 0x3c6   : > { %v3247_v60 = vor.u32 %v3444_v53, %v3244_v57 }
 0x3c7   : > { %1968 = vmatpush.bf16.msrb.mxu1 %v3075_v5  ;;  %v3154_v5 = vld [vmem:[#allocation13 + $0x40] sm:$0xf] }
 0x3c9   : > { %1955 = vmatpush.bf16.msrb.mxu0 %v3011_v2  ;;  %v3236_v2 = vld [vmem:[#allocation13 + $0xe8] sm:$0xf0] }
 0x3cb   : > { %1969 = vmatpush.bf16.msrb.mxu1 %v3067_v19 }
 0x3cf   : > { %1970 = vmatpush.bf16.msrb.mxu1 %v3059_v28  ;;  %v3148_v28 = vld [vmem:[#allocation13 + $0x38] sm:$0xf0] }
 0x435   : > { %v1706_v7 = vpop.xlane.xlu2 %1705 }
 0x436   : > { %v1714_v42 = vmul.f32 %v4188_v6, %v1706_v7  ;;  %v3015_v7 = vor.u32 %v3386_v3, %v3012_v4  ;;  %v3235_v3 = vor.u32 %v3443_v0, %v3234_v63  ;;  %v3239_v4 = vor.u32 %v3442_v1, %v3236_v2  ;;  %v3212_v63 = vld [vmem:[#allocation13 + $0xb8] sm:$0xf0]  ;;  %v3130_v1 = vld [vmem:[#allocation13 + $0x10] sm:$0xf]  ;;  %v3417_v2 = vld [vmem:[#allocation13 + $0x14] sm:$0xf0] }
 0x438   : > { %v4191_v8 = vsub.f32 %v1700_v44, %v1714_v42  ;;  %v4193_v9 = vsub.f32 %v1701_v47, %v1714_v42  ;;  %v3031_v44 = vor.u32 %v3390_v40, %v3028_v41  ;;  %v3092_v47 = vld [vmem:[#allocation11 + $0xc8] sm:$0xf0]  ;;  %v3402_v42 = vld [vmem:[#allocation11 + $0xa4] sm:$0xf]  ;;  %v3180_v40 = vld [vmem:[#allocation13 + $0x78] sm:$0xf0] }
 0x439   : > { %v3095_v48 = vor.u32 %v3406_v46, %v3092_v47  ;;  %v3170_v41 = vld [vmem:[#allocation13 + $0x60] sm:$0xf]  ;;  %v3426_v46 = vld [vmem:[#allocation13 + $0x64] sm:$0xf]  ;;  %v3172_v47 = vld [vmem:[#allocation13 + $0x68] sm:$0xf0] }
 0x43a   : > { %v1717_v10 = vmul.f32 %v4191_v8, %v4191_v8  ;;  %v1718_v11 = vmul.f32 %v4193_v9, %v4193_v9  ;;  %1979 = vmatpush.bf16.msrb.mxu2 %v3031_v44  ;;  %v3183_v44 = vor.u32 %v3428_v37, %v3180_v40  ;;  %v3171_v50 = vor.u32 %v3427_v43, %v3170_v41  ;;  %v3140_v37 = vld [vmem:[#allocation13 + $0x28] sm:$0xf0]  ;;  %v1703_v43 = vld [vmem:[%s4280_s11] sm:$0x3] }
 0x43b   : > { %1992 = vmatpush.bf16.msrb.mxu3 %v3095_v48  ;;  %v3242_v48 = vld [vmem:[#allocation13 + $0xf0] sm:$0xf]  ;;  %v3175_v54 = vor.u32 %v3426_v46, %v3172_v47  ;;  %v1744_v53 = vperm.slane %v1703_v43, 0 }
 0x43c   : > { %v1719_v12 = vadd.f32 %v1718_v11, %v1717_v10  ;;  %v3076_v10 = vld [vmem:[#allocation11 + $0xa8] sm:$0xf0]  ;;  %v3243_v56 = vor.u32 %v3445_v51, %v3242_v48 }
 0x43d   : > { %v3079_v11 = vor.u32 %v3402_v42, %v3076_v10  ;;  %v3422_v10 = vld [vmem:[#allocation13 + $0x44] sm:$0xf] }
 0x43e   : > { %1720 = vadd.xlane.f32.xlu2 %v1719_v12  ;;  %1980 = vmatpush.bf16.msrb.mxu2 %v3023_v59  ;;  %v3002_v12 = vld [vmem:[#allocation11 + $0x10] sm:$0xf]  ;;  %v3425_v59 = vld [vmem:[#allocation13 + $0x54] sm:$0xf0] }
 0x43f   : > { %1993 = vmatpush.bf16.msrb.mxu3 %v3087_v62  ;;  %v3003_v15 = vor.u32 %v3385_v13, %v3002_v12  ;;  %v3164_v62 = vld [vmem:[#allocation13 + $0x58] sm:$0xf0]  ;;  %2217 = vmatpush.bf16.msra.mxu1 %v3243_v56  ;;  %v3163_v55 = vor.u32 %v3425_v59, %v3162_v58  ;;  %v3441_v12 = vld [vmem:[#allocation13 + $0xd4] sm:$0xf0]  ;;  %v3156_v13 = vld [vmem:[#allocation13 + $0x48] sm:$0xf0] }
 0x440   : > { %v3167_v42 = vor.u32 %v3424_v61, %v3164_v62  ;;  %v3436_v61 = vld [vmem:[#allocation13 + $0xb4] sm:$0xf] }
 0x441   : > { %1956 = vmatpush.bf16.msrb.mxu0 %v3003_v15  ;;  %v3228_v15 = vld [vmem:[#allocation13 + $0xd8] sm:$0xf0]  ;;  %v3215_v0 = vor.u32 %v3436_v61, %v3212_v63 }
 0x442   : > { %1981 = vmatpush.bf16.msrb.mxu2 %v3015_v7  ;;  %v3423_v7 = vld [vmem:[#allocation13 + $0x44] sm:$0xf0]  ;;  %v3231_v19 = vor.u32 %v3440_v14, %v3228_v15  ;;  %v3122_v14 = vld [vmem:[#allocation13] sm:$0xf] }
 0x443   : > { %1994 = vmatpush.bf16.msrb.mxu3 %v3079_v11  ;;  %v3226_v11 = vld [vmem:[#allocation13 + $0xd0] sm:$0xf]  ;;  %2218 = vmatpush.bf16.msra.mxu1 %v3235_v3  ;;  %v3155_v18 = vor.u32 %v3423_v7, %v3154_v5  ;;  %v3131_v3 = vor.u32 %v3417_v2, %v3130_v1  ;;  %v3202_v7 = vld [vmem:[#allocation13 + $0xa0] sm:$0xf]  ;;  %v3415_v15 = vld [vmem:[#allocation13 + $0x4] sm:$0xf0] }
 0x444   : > { %v3227_v16 = vor.u32 %v3441_v12, %v3226_v11  ;;  %v3204_v12 = vld [vmem:[#allocation13 + $0xa8] sm:$0xf0] }
 0x445   : > { %1957 = vmatpush.bf16.msrb.mxu0 %v2995_v27  ;;  %v3420_v27 = vld [vmem:[#allocation13 + $0x34] sm:$0xf] }
 0x446   : > { %1982 = vmatpush.bf16.msrb.mxu2 %v3007_v20  ;;  %v3146_v20 = vld [vmem:[#allocation13 + $0x30] sm:$0xf] }
 0x447   : > { %1995 = vmatpush.bf16.msrb.mxu3 %v3071_v45  ;;  %v3159_v45 = vor.u32 %v3422_v10, %v3156_v13  ;;  %2219 = vmatpush.bf16.msra.mxu1 %v3227_v16  ;;  %v3147_v31 = vor.u32 %v3421_v24, %v3146_v20  ;;  %v3434_v10 = vld [vmem:[#allocation13 + $0xa4] sm:$0xf]  ;;  %v3194_v20 = vld [vmem:[#allocation13 + $0x90] sm:$0xf] }
 0x448   : > { %v3207_v13 = vor.u32 %v3434_v10, %v3204_v12  ;;  %v3414_v16 = vld [vmem:[#allocation13 + $0x4] sm:$0xf]  ;;  %v3195_v22 = vor.u32 %v3433_v21, %v3194_v20  ;;  %v2258_v20 = vld [vmem:[#allocation14] sm:$0x3] }
 0x449   : > { %2204 = vmatpush.bf16.msra.mxu0 %v3179_v39  ;;  %v1702_v39 = vld [vmem:[%s4279_s10] sm:$0x3] }
 0x44a   : > { %1983 = vmatpush.bf16.msrb.mxu2 %v2999_v32  ;;  %v3223_v32 = vor.u32 %v3438_v25, %v3220_v26  ;;  %v1737_v46 = vperm.slane %v1702_v39, 0  ;;  %v1738_v47 = vperm.slane %v1702_v39, 1  ;;  %v3186_v25 = vld [vmem:[#allocation13 + $0x80] sm:$0xf]  ;;  %v3431_v26 = vld [vmem:[#allocation13 + $0x84] sm:$0xf0] }
 0x44b   : > { %1996 = vmatpush.bf16.msrb.mxu3 %v3063_v33  ;;  %v3151_v33 = vor.u32 %v3420_v27, %v3148_v28  ;;  %2220 = vmatpush.bf16.msra.mxu1 %v3219_v30  ;;  %v3430_v27 = vld [vmem:[#allocation13 + $0x84] sm:$0xf]  ;;  %v3187_v28 = vor.u32 %v3431_v26, %v3186_v25 }
 0x44d   : > { %2205 = vmatpush.bf16.msra.mxu0 %v3171_v50 }
 0x44e   : > { %2230 = vmatpush.bf16.msra.mxu2 %v3183_v44  ;;  %v3143_v44 = vor.u32 %v3418_v36, %v3140_v37 }
 0x44f   : > { %2243 = vmatpush.bf16.msra.mxu3 %v3247_v60 }
 0x451   : > { %2206 = vmatpush.bf16.msra.mxu0 %v3163_v55  ;;  %v3416_v55 = vld [vmem:[#allocation13 + $0x14] sm:$0xf] }
 0x452   : > { %2231 = vmatpush.bf16.msra.mxu2 %v3175_v54  ;;  %v1745_v54 = vperm.slane %v1703_v43, 1 }
 0x453   : > { %2244 = vmatpush.bf16.msra.mxu3 %v3239_v4  ;;  %v3132_v4 = vld [vmem:[#allocation13 + $0x18] sm:$0xf0] }
 0x454   : > { %v3135_v5 = vor.u32 %v3416_v55, %v3132_v4 }
 0x455   : > { %2207 = vmatpush.bf16.msra.mxu0 %v3155_v18  ;;  %v3124_v18 = vld [vmem:[#allocation13 + $0x8] sm:$0xf0] }
 0x456   : > { %2232 = vmatpush.bf16.msra.mxu2 %v3167_v42  ;;  %v3435_v42 = vld [vmem:[#allocation13 + $0xa4] sm:$0xf0] }
 0x457   : > { %2245 = vmatpush.bf16.msra.mxu3 %v3231_v19  ;;  %v3203_v11 = vor.u32 %v3435_v42, %v3202_v7  ;;  %v3127_v19 = vor.u32 %v3414_v16, %v3124_v18 }
 0x459   : > { %2208 = vmatpush.bf16.msra.mxu0 %v3147_v31  ;;  %v1784_v31 = vld [vmem:[%s4276_s7] sm:$0x3] }
 0x45a   : > { %2233 = vmatpush.bf16.msra.mxu2 %v3159_v45  ;;  %v3196_v45 = vld [vmem:[#allocation13 + $0x98] sm:$0xf0]  ;;  %v1787_v36 = vperm.slane %v1784_v31, 1 }
 0x45b   : > { %2246 = vmatpush.bf16.msra.mxu3 %v3223_v32  ;;  %v1786_v32 = vperm.slane %v1784_v31, 0 }
 0x45e   : > { %2234 = vmatpush.bf16.msra.mxu2 %v3151_v33 }
 0x45f   : > { %2247 = vmatpush.bf16.msra.mxu3 %v3215_v0 }
 0x462   : > { %2235 = vmatpush.bf16.msra.mxu2 %v3143_v44 }
 0x463   : > { %2248 = vmatpush.bf16.msra.mxu3 %v3207_v13 }
 0x466   : > { %2236 = vmatpush.bf16.msra.mxu2 %v3135_v5 }
 0x46a   : > { %2237 = vmatpush.bf16.msra.mxu2 %v3127_v19 }
 0x4b1   : > { %v1721_v34 = vpop.xlane.xlu2 %1720 }
 0x4b2   : > { %v1722_v38 = vmul.f32 %v1721_v34, %v4188_v6  ;;  %v3138_v34 = vld [vmem:[#allocation13 + $0x20] sm:$0xf] }
 0x4b3   : > { %v3139_v40 = vor.u32 %v3419_v35, %v3138_v34 }
 0x4b4   : > { %v4200_v49 = vadd.f32 1e-06, %v1722_v38 }
 0x4b5   : > { %2209 = vmatpush.bf16.msra.mxu0 %v3139_v40 }
 0x4b6   : > { %3579 = vrsqrt.f32 %v4200_v49  ;;  %vm1730_vm4 = vweird.f32 %v4200_v49 }
 0x4b9   : > { %2210 = vmatpush.bf16.msra.mxu0 %v3131_v3 }
 0x4bc   : > { %v3580_v17 = vpop.eup %3579 }
 0x4bd   : > { %v1725_v23 = vmul.f32 %v3580_v17, %v4200_v49  ;;  %vm1731_vm3 = vweird.f32 %v3580_v17 }
 0x4be   : > { %vm1732_vm5 = vmor %vm1730_vm4, %vm1731_vm3 }
 0x4bf   : > { %v1726_v29 = vmul.f32 %v3580_v17, %v1725_v23  ;;  %v3432_v23 = vld [vmem:[#allocation13 + $0x94] sm:$0xf] }
 0x4c0   : > { %v3199_v24 = vor.u32 %v3432_v23, %v3196_v45  ;;  %v2259_v23 = vld [vmem:[%s4305_s6] sm:$0x3]  ;;  %v2286_v45 = vperm.slane %v2258_v20, 0 }
 0x4c1   : > { %v1727_v52 = vmul.f32 0.5, %v1726_v29  ;;  %v3188_v29 = vld [vmem:[#allocation13 + $0x88] sm:$0xf0] }
 0x4c2   : > { %2249 = vmatpush.bf16.msra.mxu3 %v3199_v24  ;;  %v3191_v30 = vor.u32 %v3430_v27, %v3188_v29  ;;  %v2287_v24 = vperm.slane %v2258_v20, 1  ;;  %v2293_v27 = vperm.slane %v2259_v23, 0 }
 0x4c3   : > { %v1728_v38 = vsub.f32 1.5, %v1727_v52 }
 0x4c5   : > { %v1729_v41 = vmul.f32 %v3580_v17, %v1728_v38 }
 0x4c6   : > { %2250 = vmatpush.bf16.msra.mxu3 %v3191_v30 }
 0x4c7   : > { %v1733_v48 = vsel %vm1732_vm5, %v3580_v17, %v1729_v41  ;;  %v3123_v17 = vor.u32 %v3415_v15, %v3122_v14 }
 0x4c8   : > { %v1734_v50 = vmul.f32 %v1733_v48, %v4191_v8  ;;  %v1735_v51 = vmul.f32 %v1733_v48, %v4193_v9  ;;  %v3210_v8 = vld [vmem:[#allocation13 + $0xb0] sm:$0xf]  ;;  %v3437_v9 = vld [vmem:[#allocation13 + $0xb4] sm:$0xf0] }
 0x4c9   : > { %v3211_v62 = vor.u32 %v3437_v9, %v3210_v8  ;;  %2211 = vmatpush.bf16.msra.mxu0 %v3123_v17 }
 0x4ca   : > { %v1741_v56 = vmul.f32 %v1737_v46, %v1734_v50  ;;  %v1742_v49 = vmul.f32 %v1738_v47, %v1735_v51 }
 0x4cb   : > { %2221 = vmatpush.bf16.msra.mxu1 %v3211_v62 }
 0x4cc   : > { %v4213_v57 = vadd.f32 %v1744_v53, %v1741_v56  ;;  %v4215_v58 = vadd.f32 %v1745_v54, %v1742_v49  ;;  %v2038_v54 = vld [vmem:[%s4304_s22] sm:$0x3]  ;;  %s3841_s22 = scalar_lea.hbm %s3840_s18, 16 }
 0x4cd   : > { %v2040_v56 = vperm.slane %v2038_v54, 0  ;;  %p3842_p1 = scmp.ne.s32.totalorder %s3840_s18, %s3841_s22  ;;  %p3847_p8 = scmp.lt.s32.totalorder %s3845_s1, %s3841_s22 }
 0x4ce   : > { %v1750_v59 = vpack.c.bf16 %v4213_v57, %v4213_v57  ;;  %v1751_v60 = vpack.c.bf16 %v4215_v58, %v4215_v58 }
 0x4cf   : > { %2222 = vmatpush.bf16.msra.mxu1 %v3203_v11  ;;  %p3843_p3 = pnand %p3842_p1, %p4092_p13  ;;  %p3848_p7 = por %p3847_p8, %p3846_p12 }
 0x4d0   : > { %1958 = vmatmul.bf16.vlgmr.msrb.gmra.mxu0 %v1750_v59  ;;  %1971 = vmatmul.bf16.vlgmr.msrb.gmra.mxu1 %v1751_v60 }
 0x4d1   : > { %1984 = vmatmul.bf16.vlgmr.msrb.gmra.mxu2 %v1750_v59  ;;  %1997 = vmatmul.bf16.vlgmr.msrb.gmra.mxu3 %v1751_v60  ;;  %v2041_v60 = vperm.slane %v2038_v54, 1  ;;  %p3844_p4 = pneg %p3843_p3 }
 0x4d3   : > { %2223 = vmatpush.bf16.msra.mxu1 %v3195_v22  ;;  %p3849_p9 = pnand %p3848_p7, %p3844_p4 }
 0x4d7   : > { %2224 = vmatpush.bf16.msra.mxu1 %v3187_v28  ;;  %v2294_v28 = vperm.slane %v2259_v23, 1 }
 0x54d   : > { %v1959_v52 = vpop.f32.mrf.mxu0  ;;  %v1972_v33 = vpop.f32.mrf.mxu1 }
 0x54e   : > { %v1960_v34 = vadd.f32 %v1959_v52, %v1786_v32 }
 0x550   : > { %v1973_v35 = vadd.f32 %v1972_v33, %v1960_v34 }
 0x552   : > { %v2002_v37 = vmax.f32 %v1973_v35, 0.0 }
 0x554   : > { %v2004_v38 = vpack.c.bf16 %v2002_v37, %v2002_v37  ;;  %v1985_v39 = vpop.f32.mrf.mxu2  ;;  %v1998_v40 = vpop.f32.mrf.mxu3 }
 0x555   : > { %v1986_v41 = vadd.f32 %v1985_v39, %v1787_v36  ;;  %v1961_v43 = vpop.f32.mrf.mxu0  ;;  %v1974_v44 = vpop.f32.mrf.mxu1 }
 0x556   : > { %2212 = vmatmul.bf16.vlgmr.msra.gmra.mxu0 %v2004_v38  ;;  %2238 = vmatmul.bf16.vlgmr.msra.gmra.mxu2 %v2004_v38 }
 0x557   : > { %v1999_v46 = vadd.f32 %v1998_v40, %v1986_v41 }
 0x559   : > { %v2003_v47 = vmax.f32 %v1999_v46, 0.0 }
 0x55b   : > { %v2005_v48 = vpack.c.bf16 %v2003_v47, %v2003_v47 }
 0x55c   : > { %v1987_v50 = vpop.f32.mrf.mxu2  ;;  %v2000_v51 = vpop.f32.mrf.mxu3 }
 0x55d   : > { %2225 = vmatmul.bf16.vlgmr.msra.gmra.mxu1 %v2005_v48  ;;  %2251 = vmatmul.bf16.vlgmr.msra.gmra.mxu3 %v2005_v48 }
 0x5d3   : > { %v2213_v53 = vpop.f32.mrf.mxu0 }
 0x5d4   : > { %v2214_v9 = vadd.f32 %v2213_v53, %v2040_v56 }
 0x5d9   : > { %v2239_v49 = vpop.f32.mrf.mxu2 }
 0x5da   : > { %v2226_v59 = vpop.f32.mrf.mxu1  ;;  %v2240_v62 = vadd.f32 %v2239_v49, %v2041_v60 }
 0x5db   : > { %v2215_v8 = vpop.f32.mrf.mxu0  ;;  %v2227_v61 = vadd.f32 %v2226_v59, %v2214_v9 }
 0x5dd   : > { %v2256_v55 = vadd.f32 %v2227_v61, %v4213_v57 }
 0x5e0   : > { %v2252_v63 = vpop.f32.mrf.mxu3 }
 0x5e1   : > { %v2253_v0 = vadd.f32 %v2252_v63, %v2240_v62  ;;  %v2241_v1 = vpop.f32.mrf.mxu2 }
 0x5e2   : > { %v2228_v2 = vpop.f32.mrf.mxu1 }
 0x5e3   : > { %v2257_v3 = vadd.f32 %v2253_v0, %v4215_v58 }
 0x5e5   : > { %v2260_v4 = vadd.f32 %v2257_v3, %v2256_v55 }
 0x5e7   : > { %2261 = vadd.xlane.f32.xlu0 %v2260_v4 }
 0x5e8   : > { %v2254_v5 = vpop.f32.mrf.mxu3 }
 0x65a   : > { %v2262_v7 = vpop.xlane.xlu0 %2261 }
 0x65b   : > { %v2263_v42 = vmul.f32 %v2262_v7, %v4188_v6 }
 0x65d   : > { %v2264_v10 = vsub.f32 %v2256_v55, %v2263_v42  ;;  %v2265_v11 = vsub.f32 %v2257_v3, %v2263_v42 }
 0x65f   : > { %v2266_v12 = vmul.f32 %v2264_v10, %v2264_v10  ;;  %v2267_v13 = vmul.f32 %v2265_v11, %v2265_v11 }
 0x661   : > { %v2268_v14 = vadd.f32 %v2267_v13, %v2266_v12 }
 0x663   : > { %2269 = vadd.xlane.f32.xlu1 %v2268_v14 }
 0x6d6   : > { %v2270_v15 = vpop.xlane.xlu1 %2269 }
 0x6d7   : > { %v2271_v16 = vmul.f32 %v2270_v15, %v4188_v6 }
 0x6d9   : > { %v2272_v17 = vadd.f32 1e-06, %v2271_v16 }
 0x6db   : > { %3581 = vrsqrt.f32 %v2272_v17  ;;  %vm2279_vm7 = vweird.f32 %v2272_v17 }
 0x6e1   : > { %v3582_v57 = vpop.eup %3581 }
 0x6e2   : > { %v2274_v58 = vmul.f32 %v3582_v57, %v2272_v17  ;;  %vm2280_vm6 = vweird.f32 %v3582_v57 }
 0x6e3   : > { %vm2281_vm8 = vmor %vm2279_vm7, %vm2280_vm6 }
 0x6e4   : > { %v2275_v18 = vmul.f32 %v3582_v57, %v2274_v58 }
 0x6e6   : > { %v2276_v19 = vmul.f32 0.5, %v2275_v18 }
 0x6e8   : > { %v2277_v21 = vsub.f32 1.5, %v2276_v19 }
 0x6ea   : > { %v2278_v22 = vmul.f32 %v3582_v57, %v2277_v21 }
 0x6ec   : > { %v2282_v6 = vsel %vm2281_vm8, %v3582_v57, %v2278_v22 }
 0x6ed   : > { %v2283_v25 = vmul.f32 %v2282_v6, %v2264_v10  ;;  %v2284_v26 = vmul.f32 %v2282_v6, %v2265_v11 }
 0x6ef   : > { %v2290_v29 = vmul.f32 %v2286_v45, %v2283_v25  ;;  %v2291_v30 = vmul.f32 %v2287_v24, %v2284_v26 }
 0x6f1   : > { %v2297_v31 = vadd.f32 %v2293_v27, %v2290_v29  ;;  %v2298_v32 = vadd.f32 %v2294_v28, %v2291_v30 }
 0x6f3   : > { %2299 = vst [vmem:[%s595_s20] sm:$0xff] %v2297_v31 }
 0x6f4   : > { %2300 = vst [vmem:[%s595_s20 + $0x8] sm:$0xff] %v2298_v32 }
 0x6f5   : > { %3852 = shalt.err (!%p3849_p9)
}
 0x6f6   : > { %3477 = dma.vmem_to_hbm [thread:$0]  (%p4092_p13), %s2316_s3, 256, %s2318_s17, %s2302_s23  }
 0x6f7 PF: > { %s2329_s19 = sand.u32 1, %s3895_s29   ;;  %p4307_p10 = scmp.ge.s32.totalorder %s3907_s16, 2 }
 0x6f8   : > { %s2330_s21 = scalar_lea.sflag [#allocation4], %s2329_s19 }
 0x6f9   : > { %p3506_p11 = pnand %p4307_p10, %p4097_p5 }
 0x6fb   : > { %p3507_p0 = pneg %p3506_p11 }
 0x6fd   : > { %3890 = dma.done.wait (%p3507_p0), %s2330_s21, 256  }
 0x6fe   : > { %3892 = vsyncadd (%p3507_p0), %s2330_s21, 4294967040  ;;  %p31_p2 = scmp.ge.s32.totalorder %s4072_s14, 4   ;;  %s4308_s29 = smov %s3899_s30 }
 0x6ff   : > { %s4309_s30 = smov %s3903_s15  ;;  %s4310_s15 = smov %s4084_s9 }
 0x700   : > { %s4311_s16 = smov %s4072_s14  ;;  %33 = sbr.rel (!%p31_p2) target bundleno = 18 (0x12), region = 149 }
 0x705   :  { %2336 = vsyncpa [#allocation3], 1 }
 0x706   :  { %2338 = vsyncpa [#allocation3 + $0x1], 1 }
 0x707   :  { %2339 = vsyncpa [#allocation6], 1 }
 0x708   :  { %2340 = vsyncpa [#allocation9], 1 }
 0x709   :  { %2341 = vsyncpa [#allocation12], 1 }
 0x70a   :  { %2342 = vsyncpa [#allocation15], 1 }
 0x70b   :  { %2343 = vsyncpa [#allocation4], 1 }
 0x70c   :  { %2345 = vsyncpa [#allocation4 + $0x1], 1 }

</bundles_post_ra>
